<compile_context>
chip_gen: v6e
topology: v6e:2x2x1
jax: 0.10.0
libtpu: 0.0.40
codegen_flags: <defaults>
</compile_context>

<pallas_src>
import jax
import jax.numpy as jnp
from jax.experimental import pallas as pl
from jax.experimental.pallas import tpu as pltpu


def _round_up(n, m):
    return ((n + m - 1) // m) * m


def cvae_kernel(xt_ref, eps_ref,
                w1_ref, b1_ref, w2_ref, b2_ref,
                w3_ref, b3_ref, w4_ref, b4_ref,
                recon_ref, mu_ref, logvar_ref):
    f32 = jnp.float32
    bf16 = jnp.bfloat16
    hp = mu_ref.shape[-1]

    # encode: h1 = relu(fc1(cat(x, one_hot)))  -- concat already folded into xt
    xt = xt_ref[...]                                          # bf16 (B_TILE, K1)
    h1 = jnp.dot(xt, w1_ref[...], preferred_element_type=f32) + b1_ref[...]
    h1 = jnp.maximum(h1, 0.0)

    # fused fc21/fc22 head: one (512, 2*Hp) matmul, split by static lane slice
    h2 = jnp.dot(h1.astype(bf16), w2_ref[...],
                 preferred_element_type=f32) + b2_ref[...]
    mu = h2[:, :hp]
    logvar = h2[:, hp:]

    # reparameterize: z = eps * exp(0.5*logvar) + mu   (all f32 on VPU/EUP)
    std = jnp.exp(0.5 * logvar)
    z = eps_ref[...] * std + mu

    # decode (torch code discards cat((z, targets), 1) -> only z is used)
    h3 = jnp.dot(z.astype(bf16), w3_ref[...],
                 preferred_element_type=f32) + b3_ref[...]
    h3 = jnp.maximum(h3, 0.0)
    logits = jnp.dot(h3.astype(bf16), w4_ref[...],
                     preferred_element_type=f32) + b4_ref[...]

    recon_ref[...] = jax.nn.sigmoid(logits)
    mu_ref[...] = mu
    logvar_ref[...] = logvar


def init_params(key, input_size, max_label, hidden_size=20):
    """torch.nn.Linear-style init, packed/padded to lane-dense TPU shapes."""
    C = max_label + 1
    D = input_size
    H = hidden_size + C
    N = 512
    K1 = _round_up(D + C, 128)   # fc1 input  (x ++ one_hot ++ zero pad)
    Hp = _round_up(H, 128)       # padded latent width
    Dp = _round_up(D, 128)       # padded reconstruction width

    def linear(k, fan_in, fan_out):
        kw, kb = jax.random.split(k)
        bound = 1.0 / (fan_in ** 0.5)
        w = jax.random.uniform(kw, (fan_in, fan_out), jnp.float32, -bound, bound)
        b = jax.random.uniform(kb, (fan_out,), jnp.float32, -bound, bound)
        return w, b

    k1, k21, k22, k3, k4 = jax.random.split(key, 5)
    w1, b1 = linear(k1, D + C, N)      # fc1  (stored [in, out])
    w21, b21 = linear(k21, N, H)       # fc21
    w22, b22 = linear(k22, N, H)       # fc22
    w3, b3 = linear(k3, H, N)          # fc3
    w4, b4 = linear(k4, N, D)          # fc4

    # f32 packed/padded masters (also used by the pure-JAX reference)
    W1 = jnp.zeros((K1, N), jnp.float32).at[:D + C, :].set(w1)
    B1 = b1.reshape(1, N)
    W2 = (jnp.zeros((N, 2 * Hp), jnp.float32)
          .at[:, :H].set(w21).at[:, Hp:Hp + H].set(w22))
    B2 = (jnp.zeros((1, 2 * Hp), jnp.float32)
          .at[0, :H].set(b21).at[0, Hp:Hp + H].set(b22))
    W3 = jnp.zeros((Hp, N), jnp.float32).at[:H, :].set(w3)
    B3 = b3.reshape(1, N)
    W4 = jnp.zeros((N, Dp), jnp.float32).at[:, :D].set(w4)
    B4 = jnp.zeros((1, Dp), jnp.float32).at[0, :D].set(b4)

    ref = dict(W1=W1, B1=B1, W2=W2, B2=B2, W3=W3, B3=B3, W4=W4, B4=B4)
    kern = dict(W1=W1.astype(jnp.bfloat16), B1=B1,
                W2=W2.astype(jnp.bfloat16), B2=B2,
                W3=W3.astype(jnp.bfloat16), B3=B3,
                W4=W4.astype(jnp.bfloat16), B4=B4)
    dims = dict(D=D, C=C, H=H, K1=K1, Hp=Hp, Dp=Dp, N=N)
    return dict(kern=kern, ref=ref, dims=dims)


def cvae_forward(x, targets, eps, params, *, b_tile=128):
    # b_tile: 128 keeps the MXU M dim full; bump to 256-512 for large batches
    # (still far under the 32 MiB scoped VMEM limit, including v7x's 64 MiB chip).
    d = params["dims"]
    w = params["kern"]
    D, C, H, K1, Hp, Dp, N = d["D"], d["C"], d["H"], d["K1"], d["Hp"], d["Dp"], d["N"]
    B = x.shape[0]
    nb = -(-B // b_tile)
    Bp = nb * b_tile

    # Host-side glue: fold cat(x, one_hot(targets)) into the padded K dim of fc1.
    onehot = jax.nn.one_hot(targets, C, dtype=jnp.float32)
    xt = (jnp.zeros((Bp, K1), jnp.float32)
          .at[:B, :D].set(x)
          .at[:B, D:D + C].set(onehot)
          .astype(jnp.bfloat16))
    eps_p = jnp.zeros((Bp, Hp), jnp.float32).at[:B, :H].set(eps)

    inputs = (xt, eps_p,
              w["W1"], w["B1"], w["W2"], w["B2"],
              w["W3"], w["B3"], w["W4"], w["B4"])

    def act_spec(feat):                       # batch-tiled activation stream
        return pl.BlockSpec((b_tile, feat), lambda i: (i, 0))

    def resident(arr):                        # full array, constant block index
        return pl.BlockSpec(arr.shape, lambda i: (0, 0))

    in_specs = [act_spec(K1), act_spec(Hp)] + [resident(a) for a in inputs[2:]]
    out_specs = (act_spec(Dp), act_spec(Hp), act_spec(Hp))
    out_shape = (jax.ShapeDtypeStruct((Bp, Dp), jnp.float32),   # reconstruction
                 jax.ShapeDtypeStruct((Bp, Hp), jnp.float32),   # mu
                 jax.ShapeDtypeStruct((Bp, Hp), jnp.float32))   # logvar

    flops = 2 * Bp * (K1 * N + N * 2 * Hp + Hp * N + N * Dp)
    transcendentals = Bp * (Hp + Dp)          # exp for std + exp inside sigmoid
    bytes_in = sum(int(a.size) * a.dtype.itemsize for a in inputs)
    bytes_out = Bp * (Dp + 2 * Hp) * 4

    recon_p, mu_p, logvar_p = pl.pallas_call(
        cvae_kernel,
        out_shape=out_shape,
        grid=(nb,),
        in_specs=in_specs,
        out_specs=out_specs,
        compiler_params=pltpu.CompilerParams(
            dimension_semantics=("parallel",),
            vmem_limit_bytes=32 * 1024 * 1024),
        cost_estimate=pl.CostEstimate(flops=flops,
                                      transcendentals=transcendentals,
                                      bytes_accessed=bytes_in + bytes_out),
    )(*inputs)

    return recon_p[:B, :D], mu_p[:B, :H], logvar_p[:B, :H]


def cvae_reference(x, targets, eps, params):
    """Pure-JAX f32 reference (same packed weights, pre bf16 cast)."""
    d = params["dims"]
    r = params["ref"]
    B = x.shape[0]
    D, C, H, K1, Hp = d["D"], d["C"], d["H"], d["K1"], d["Hp"]
    onehot = jax.nn.one_hot(targets, C, dtype=jnp.float32)
    xt = (jnp.zeros((B, K1), jnp.float32)
          .at[:, :D].set(x).at[:, D:D + C].set(onehot))
    h1 = jax.nn.relu(xt @ r["W1"] + r["B1"])
    h2 = h1 @ r["W2"] + r["B2"]
    mu = h2[:, :Hp][:, :H]
    logvar = h2[:, Hp:][:, :H]
    z = eps * jnp.exp(0.5 * logvar) + mu
    zp = jnp.zeros((B, Hp), jnp.float32).at[:, :H].set(z)
    h3 = jax.nn.relu(zp @ r["W3"] + r["B3"])
    recon = jax.nn.sigmoid(h3 @ r["W4"] + r["B4"])[:, :D]
    return recon, mu, logvar


if __name__ == "__main__":
    key = jax.random.PRNGKey(0)
    k_param, k_x, k_t, k_eps = jax.random.split(key, 4)

    B = 8             # batch
    input_size = 64   # flattened input features
    max_label = 9     # 10 classes
    hidden_size = 20
    C = max_label + 1
    H = hidden_size + C   # 30

    params = init_params(k_param, input_size, max_label, hidden_size)

    x = jax.random.uniform(k_x, (B, input_size), jnp.float32)
    targets = jax.random.randint(k_t, (B,), 0, C)
    eps = jax.random.normal(k_eps, (B, H), jnp.float32)   # torch.randn_like(std)

    recon, mu, logvar = jax.block_until_ready(
        cvae_forward(x, targets, eps, params))

    assert recon.shape == (B, input_size)
    assert mu.shape == (B, H)
    assert logvar.shape == (B, H)
    assert bool(jnp.all(jnp.isfinite(recon)))
    assert bool(jnp.all((recon >= 0.0) & (recon <= 1.0)))

    # Numerical check against the pure-JAX f32 reference (bf16 MXU operands ->
    # loose tolerance).
    ref_recon, ref_mu, ref_logvar = cvae_reference(x, targets, eps, params)
    max_err = max(float(jnp.max(jnp.abs(recon - ref_recon))),
                  float(jnp.max(jnp.abs(mu - ref_mu))),
                  float(jnp.max(jnp.abs(logvar - ref_logvar))))
    assert max_err < 0.1, f"max abs error vs reference too large: {max_err}"

    print("KERNEL_OK")
</pallas_src>

<mosaic_0001>
module attributes {stable_mosaic.version = 11 : i64} {
  func.func @cvae_kernel(%arg0: i32, %arg1: memref<128x128xbf16, #tpu.memory_space<vmem>>, %arg2: memref<128x128xf32, #tpu.memory_space<vmem>>, %arg3: memref<128x512xbf16, #tpu.memory_space<vmem>>, %arg4: memref<1x512xf32, #tpu.memory_space<vmem>>, %arg5: memref<512x256xbf16, #tpu.memory_space<vmem>>, %arg6: memref<1x256xf32, #tpu.memory_space<vmem>>, %arg7: memref<128x512xbf16, #tpu.memory_space<vmem>>, %arg8: memref<1x512xf32, #tpu.memory_space<vmem>>, %arg9: memref<512x128xbf16, #tpu.memory_space<vmem>>, %arg10: memref<1x128xf32, #tpu.memory_space<vmem>>, %arg11: memref<128x128xf32, #tpu.memory_space<vmem>>, %arg12: memref<128x128xf32, #tpu.memory_space<vmem>>, %arg13: memref<128x128xf32, #tpu.memory_space<vmem>>) attributes {dimension_semantics = [#tpu.dimension_semantics<parallel>], iteration_bounds = array<i64: 1>, scalar_prefetch = 0 : i64, scratch_operands = 0 : i64, tpu.core_type = #tpu.core_type<tc>, window_params = [{transform_indices = @transform_0, window_bounds = array<i64: 128, 128>}, {transform_indices = @transform_1, window_bounds = array<i64: 128, 128>}, {pipeline_mode = #tpu.pipeline_mode<synchronous>, transform_indices = @transform_2, window_bounds = array<i64: 128, 512>}, {pipeline_mode = #tpu.pipeline_mode<synchronous>, transform_indices = @transform_3, window_bounds = array<i64: 1, 512>}, {pipeline_mode = #tpu.pipeline_mode<synchronous>, transform_indices = @transform_4, window_bounds = array<i64: 512, 256>}, {pipeline_mode = #tpu.pipeline_mode<synchronous>, transform_indices = @transform_5, window_bounds = array<i64: 1, 256>}, {pipeline_mode = #tpu.pipeline_mode<synchronous>, transform_indices = @transform_6, window_bounds = array<i64: 128, 512>}, {pipeline_mode = #tpu.pipeline_mode<synchronous>, transform_indices = @transform_7, window_bounds = array<i64: 1, 512>}, {pipeline_mode = #tpu.pipeline_mode<synchronous>, transform_indices = @transform_8, window_bounds = array<i64: 512, 128>}, {pipeline_mode = #tpu.pipeline_mode<synchronous>, transform_indices = @transform_9, window_bounds = array<i64: 1, 128>}, {transform_indices = @transform_10, window_bounds = array<i64: 128, 128>}, {transform_indices = @transform_11, window_bounds = array<i64: 128, 128>}, {transform_indices = @transform_12, window_bounds = array<i64: 128, 128>}]} {
    %c0 = arith.constant 0 : index
    %c0_0 = arith.constant 0 : index
    %0 = vector.load %arg1[%c0, %c0_0] : memref<128x128xbf16, #tpu.memory_space<vmem>>, vector<128x128xbf16>
    %c0_1 = arith.constant 0 : index
    %c0_2 = arith.constant 0 : index
    %1 = vector.load %arg3[%c0_1, %c0_2] : memref<128x512xbf16, #tpu.memory_space<vmem>>, vector<128x512xbf16>
    %cst = arith.constant dense<0.000000e+00> : vector<128x512xf32>
    %2 = tpu.matmul %0, %1, %cst {dimension_numbers = #tpu.dot_dimension_numbers<[1], [0], [0], [1], [0, 0, 1, 1], [], []>} : vector<128x128xbf16>, vector<128x512xbf16>, vector<128x512xf32> -> vector<128x512xf32>
    %c0_3 = arith.constant 0 : index
    %c0_4 = arith.constant 0 : index
    %3 = vector.load %arg4[%c0_3, %c0_4] : memref<1x512xf32, #tpu.memory_space<vmem>>, vector<1x512xf32>
    %4 = vector.broadcast %3 : vector<1x512xf32> to vector<128x512xf32>
    %5 = arith.addf %2, %4 : vector<128x512xf32>
    %cst_5 = arith.constant 0.000000e+00 : f32
    %6 = vector.broadcast %cst_5 : f32 to vector<128x512xf32>
    %7 = arith.maximumf %5, %6 : vector<128x512xf32>
    %8 = arith.truncf %7 : vector<128x512xf32> to vector<128x512xbf16>
    %c0_6 = arith.constant 0 : index
    %c0_7 = arith.constant 0 : index
    %9 = vector.load %arg5[%c0_6, %c0_7] : memref<512x256xbf16, #tpu.memory_space<vmem>>, vector<512x256xbf16>
    %cst_8 = arith.constant dense<0.000000e+00> : vector<128x256xf32>
    %10 = tpu.matmul %8, %9, %cst_8 {dimension_numbers = #tpu.dot_dimension_numbers<[1], [0], [0], [1], [0, 0, 1, 1], [], []>} : vector<128x512xbf16>, vector<512x256xbf16>, vector<128x256xf32> -> vector<128x256xf32>
    %c0_9 = arith.constant 0 : index
    %c0_10 = arith.constant 0 : index
    %11 = vector.load %arg6[%c0_9, %c0_10] : memref<1x256xf32, #tpu.memory_space<vmem>>, vector<1x256xf32>
    %12 = vector.broadcast %11 : vector<1x256xf32> to vector<128x256xf32>
    %13 = arith.addf %10, %12 : vector<128x256xf32>
    %14 = vector.extract_strided_slice %13 {offsets = [0, 0], sizes = [128, 128], strides = [1, 1]} : vector<128x256xf32> to vector<128x128xf32>
    %15 = vector.extract_strided_slice %13 {offsets = [0, 128], sizes = [128, 128], strides = [1, 1]} : vector<128x256xf32> to vector<128x128xf32>
    %cst_11 = arith.constant 5.000000e-01 : f32
    %16 = vector.broadcast %cst_11 : f32 to vector<128x128xf32>
    %17 = arith.mulf %16, %15 : vector<128x128xf32>
    %18 = math.exp %17 : vector<128x128xf32>
    %c0_12 = arith.constant 0 : index
    %c0_13 = arith.constant 0 : index
    %19 = vector.load %arg2[%c0_12, %c0_13] : memref<128x128xf32, #tpu.memory_space<vmem>>, vector<128x128xf32>
    %20 = arith.mulf %19, %18 : vector<128x128xf32>
    %21 = arith.addf %20, %14 : vector<128x128xf32>
    %22 = arith.truncf %21 : vector<128x128xf32> to vector<128x128xbf16>
    %c0_14 = arith.constant 0 : index
    %c0_15 = arith.constant 0 : index
    %23 = vector.load %arg7[%c0_14, %c0_15] : memref<128x512xbf16, #tpu.memory_space<vmem>>, vector<128x512xbf16>
    %cst_16 = arith.constant dense<0.000000e+00> : vector<128x512xf32>
    %24 = tpu.matmul %22, %23, %cst_16 {dimension_numbers = #tpu.dot_dimension_numbers<[1], [0], [0], [1], [0, 0, 1, 1], [], []>} : vector<128x128xbf16>, vector<128x512xbf16>, vector<128x512xf32> -> vector<128x512xf32>
    %c0_17 = arith.constant 0 : index
    %c0_18 = arith.constant 0 : index
    %25 = vector.load %arg8[%c0_17, %c0_18] : memref<1x512xf32, #tpu.memory_space<vmem>>, vector<1x512xf32>
    %26 = vector.broadcast %25 : vector<1x512xf32> to vector<128x512xf32>
    %27 = arith.addf %24, %26 : vector<128x512xf32>
    %cst_19 = arith.constant 0.000000e+00 : f32
    %28 = vector.broadcast %cst_19 : f32 to vector<128x512xf32>
    %29 = arith.maximumf %27, %28 : vector<128x512xf32>
    %30 = arith.truncf %29 : vector<128x512xf32> to vector<128x512xbf16>
    %c0_20 = arith.constant 0 : index
    %c0_21 = arith.constant 0 : index
    %31 = vector.load %arg9[%c0_20, %c0_21] : memref<512x128xbf16, #tpu.memory_space<vmem>>, vector<512x128xbf16>
    %cst_22 = arith.constant dense<0.000000e+00> : vector<128x128xf32>
    %32 = tpu.matmul %30, %31, %cst_22 {dimension_numbers = #tpu.dot_dimension_numbers<[1], [0], [0], [1], [0, 0, 1, 1], [], []>} : vector<128x512xbf16>, vector<512x128xbf16>, vector<128x128xf32> -> vector<128x128xf32>
    %c0_23 = arith.constant 0 : index
    %c0_24 = arith.constant 0 : index
    %33 = vector.load %arg10[%c0_23, %c0_24] : memref<1x128xf32, #tpu.memory_space<vmem>>, vector<1x128xf32>
    %34 = vector.broadcast %33 : vector<1x128xf32> to vector<128x128xf32>
    %35 = arith.addf %32, %34 : vector<128x128xf32>
    %36 = arith.negf %35 : vector<128x128xf32>
    %37 = math.exp %36 : vector<128x128xf32>
    %cst_25 = arith.constant 1.000000e+00 : f32
    %38 = vector.broadcast %cst_25 : f32 to vector<128x128xf32>
    %39 = arith.addf %38, %37 : vector<128x128xf32>
    %40 = arith.divf %38, %39 : vector<128x128xf32>
    %c0_26 = arith.constant 0 : index
    %c0_27 = arith.constant 0 : index
    %41 = vector.load %arg11[%c0_26, %c0_27] : memref<128x128xf32, #tpu.memory_space<vmem>>, vector<128x128xf32>
    tpu.vector_store %arg11[%c0_26, %c0_27], %40 {strides = array<i32>} : memref<128x128xf32, #tpu.memory_space<vmem>>, vector<128x128xf32>,
    %c0_28 = arith.constant 0 : index
    %c0_29 = arith.constant 0 : index
    %42 = vector.load %arg12[%c0_28, %c0_29] : memref<128x128xf32, #tpu.memory_space<vmem>>, vector<128x128xf32>
    tpu.vector_store %arg12[%c0_28, %c0_29], %14 {strides = array<i32>} : memref<128x128xf32, #tpu.memory_space<vmem>>, vector<128x128xf32>,
    %c0_30 = arith.constant 0 : index
    %c0_31 = arith.constant 0 : index
    %43 = vector.load %arg13[%c0_30, %c0_31] : memref<128x128xf32, #tpu.memory_space<vmem>>, vector<128x128xf32>
    tpu.vector_store %arg13[%c0_30, %c0_31], %15 {strides = array<i32>} : memref<128x128xf32, #tpu.memory_space<vmem>>, vector<128x128xf32>,
    return
  }
  func.func @transform_0(%arg0: i32) -> (i32, i32) {
    %c0_i32 = arith.constant 0 : i32
    %c0_i32_0 = arith.constant 0 : i32
    return %arg0, %c0_i32 : i32, i32
  }
  func.func @transform_1(%arg0: i32) -> (i32, i32) {
    %c0_i32 = arith.constant 0 : i32
    %c0_i32_0 = arith.constant 0 : i32
    return %arg0, %c0_i32 : i32, i32
  }
  func.func @transform_2(%arg0: i32) -> (i32, i32) {
    %c0_i32 = arith.constant 0 : i32
    %c0_i32_0 = arith.constant 0 : i32
    %c0_i32_1 = arith.constant 0 : i32
    return %c0_i32, %c0_i32_0 : i32, i32
  }
  func.func @transform_3(%arg0: i32) -> (i32, i32) {
    %c0_i32 = arith.constant 0 : i32
    %c0_i32_0 = arith.constant 0 : i32
    %c0_i32_1 = arith.constant 0 : i32
    return %c0_i32, %c0_i32_0 : i32, i32
  }
  func.func @transform_4(%arg0: i32) -> (i32, i32) {
    %c0_i32 = arith.constant 0 : i32
    %c0_i32_0 = arith.constant 0 : i32
    %c0_i32_1 = arith.constant 0 : i32
    return %c0_i32, %c0_i32_0 : i32, i32
  }
  func.func @transform_5(%arg0: i32) -> (i32, i32) {
    %c0_i32 = arith.constant 0 : i32
    %c0_i32_0 = arith.constant 0 : i32
    %c0_i32_1 = arith.constant 0 : i32
    return %c0_i32, %c0_i32_0 : i32, i32
  }
  func.func @transform_6(%arg0: i32) -> (i32, i32) {
    %c0_i32 = arith.constant 0 : i32
    %c0_i32_0 = arith.constant 0 : i32
    %c0_i32_1 = arith.constant 0 : i32
    return %c0_i32, %c0_i32_0 : i32, i32
  }
  func.func @transform_7(%arg0: i32) -> (i32, i32) {
    %c0_i32 = arith.constant 0 : i32
    %c0_i32_0 = arith.constant 0 : i32
    %c0_i32_1 = arith.constant 0 : i32
    return %c0_i32, %c0_i32_0 : i32, i32
  }
  func.func @transform_8(%arg0: i32) -> (i32, i32) {
    %c0_i32 = arith.constant 0 : i32
    %c0_i32_0 = arith.constant 0 : i32
    %c0_i32_1 = arith.constant 0 : i32
    return %c0_i32, %c0_i32_0 : i32, i32
  }
  func.func @transform_9(%arg0: i32) -> (i32, i32) {
    %c0_i32 = arith.constant 0 : i32
    %c0_i32_0 = arith.constant 0 : i32
    %c0_i32_1 = arith.constant 0 : i32
    return %c0_i32, %c0_i32_0 : i32, i32
  }
  func.func @transform_10(%arg0: i32) -> (i32, i32) {
    %c0_i32 = arith.constant 0 : i32
    %c0_i32_0 = arith.constant 0 : i32
    return %arg0, %c0_i32 : i32, i32
  }
  func.func @transform_11(%arg0: i32) -> (i32, i32) {
    %c0_i32 = arith.constant 0 : i32
    %c0_i32_0 = arith.constant 0 : i32
    return %arg0, %c0_i32 : i32, i32
  }
  func.func @transform_12(%arg0: i32) -> (i32, i32) {
    %c0_i32 = arith.constant 0 : i32
    %c0_i32_0 = arith.constant 0 : i32
    return %arg0, %c0_i32 : i32, i32
  }
}

</mosaic_0001>

<bundles_post_ra>
// kernel: tpu_custom_call.1
= control target key start
LH: loop header
LB: loop body
LE: loop exit
PB: predicated region body
PF: predicated region fallthrough
CT: control target
= control target key end

     0   :  { %18 = vsyncpa [#allocation3], 0  ;;  %s3974_s0 = inlined_call_operand.hbm [shape: bf16[128,128], index: 0, kind: input, shape index: {}]   ;;  %s3975_s1 = inlined_call_operand.hbm [shape: f32[128,128], index: 1, kind: input, shape index: {}]   ;;  %s3976_s2 = inlined_call_operand.hbm [shape: bf16[128,512], index: 2, kind: input, shape index: {}]   ;;  %s3977_s3 = inlined_call_operand.vmem [shape: f32[1,512], index: 3, kind: input, shape index: {}]   ;;  %s3978_s4 = inlined_call_operand.hbm [shape: bf16[512,256], index: 4, kind: input, shape index: {}]   ;;  %s3979_s5 = inlined_call_operand.hbm [shape: f32[1,256], index: 5, kind: input, shape index: {}]   ;;  %s3980_s6 = inlined_call_operand.hbm [shape: bf16[128,512], index: 6, kind: input, shape index: {}]   ;;  %s3981_s7 = inlined_call_operand.vmem [shape: f32[1,512], index: 7, kind: input, shape index: {}]   ;;  %s3982_s8 = inlined_call_operand.hbm [shape: bf16[512,128], index: 8, kind: input, shape index: {}]   ;;  %s3983_s9 = inlined_call_operand.vmem [shape: f32[1,128], index: 9, kind: input, shape index: {}]   ;;  %s3984_s10 = inlined_call_operand.hbm [shape: f32[128,128], index: 10, kind: output, shape index: {0}]   ;;  %s3985_s11 = inlined_call_operand.hbm [shape: f32[128,128], index: 11, kind: output, shape index: {1}]   ;;  %s3986_s12 = inlined_call_operand.hbm [shape: f32[128,128], index: 12, kind: output, shape index: {2}]  }
   0x1   :  { %19 = vsyncpa [#allocation6], 0 }
   0x2   :  { %20 = vsyncpa [#allocation9], 0 }
   0x3   :  { %21 = vsyncpa [#allocation12], 0 }
   0x4   :  { %22 = vsyncpa [#allocation4], 0 }
   0x5   :  { %23 = vsyncpa [#allocation16], 0  ;;  %s3518_s21 = smov [#allocation5]  }
   0x6   :  { %s41_s22 = sshll.u32 %s3518_s21, 4  ;;  %s42_s22 = int_to_ptr.vmem [resolvable:$true] %s41_s22 }
   0x7   :  { %s3314_s23 = scalar_lea.vmem %s42_s22, 2048  ;;  %p3319_p1 = scmp.lt.s32.totalorder %s42_s22, %s42_s22 }
   0x8   :  { %p3315_p0 = scmp.ne.s32.totalorder %s42_s22, %s3314_s23  ;;  %p3320_p2 = scmp.lt.s32.totalorder %s3314_s23, %s3314_s23 }
   0xa   :  { %p3321_p3 = por %p3320_p2, %p3319_p1 }
   0xc   :  { %p3322_p4 = pnand %p3321_p3, %p3315_p0 }
   0xe   :  { %3325 = shalt.err (!%p3322_p4)
}
   0xf   :  { %s3519_s24 = smov 128   ;;  %s3520_s25 = smov 8  }
  0x10   :  { %47 = dma.hbm_to_vmem [thread:$0]  %s3975_s1, 2048, %s42_s22, [#allocation6], %s3519_s24, %s3519_s24, %s3520_s25  }
  0x11   :  { %s3521_s28 = smov [#allocation8]  }
  0x12   :  { %s67_s29 = sshll.u32 %s3521_s28, 4  ;;  %s68_s29 = int_to_ptr.vmem [resolvable:$true] %s67_s29 }
  0x13   :  { %s3334_s30 = scalar_lea.vmem %s68_s29, 8192  ;;  %p3339_p6 = scmp.lt.s32.totalorder %s68_s29, %s68_s29 }
  0x14   :  { %p3335_p5 = scmp.ne.s32.totalorder %s68_s29, %s3334_s30  ;;  %p3340_p7 = scmp.lt.s32.totalorder %s3334_s30, %s3334_s30 }
  0x16   :  { %p3341_p8 = por %p3340_p7, %p3339_p6 }
  0x18   :  { %p3342_p9 = pnand %p3341_p8, %p3335_p5 }
  0x1a   :  { %3345 = shalt.err (!%p3342_p9)
}
  0x1b   :  { %73 = dma.hbm_to_vmem [thread:$0]  %s3978_s4, 8192, %s68_s29, [#allocation9], %s3519_s24, %s3519_s24, %s3520_s25  }
  0x1c   :  { %s3522_s15 = smov [#allocation11]   ;;  %s3523_s1 = smov [#allocation2]  }
  0x1d   :  { %s89_s16 = sshll.u32 %s3522_s15, 4  ;;  %s29_s17 = sshll.u32 %s3523_s1, 4  ;;  %s90_s16 = int_to_ptr.vmem [resolvable:$true] %s89_s16  ;;  %s30_s17 = int_to_ptr.vmem [resolvable:$true] %s29_s17 }
  0x1e   :  { %s3354_s18 = scalar_lea.vmem %s90_s16, 4096  ;;  %p3359_p11 = scmp.lt.s32.totalorder %s90_s16, %s90_s16 }
  0x1f   :  { %p3355_p10 = scmp.ne.s32.totalorder %s90_s16, %s3354_s18  ;;  %p3360_p12 = scmp.lt.s32.totalorder %s3354_s18, %s3354_s18 }
  0x21   :  { %p3361_p13 = por %p3360_p12, %p3359_p11 }
  0x23   :  { %p3362_p0 = pnand %p3361_p13, %p3355_p10 }
  0x25   :  { %3365 = shalt.err (!%p3362_p0)
}
  0x26   :  { %s3524_s19 = smov 256   ;;  %s3525_s20 = smov 16  }
  0x27   :  { %95 = dma.hbm_to_vmem [thread:$0]  %s3980_s6, 4096, %s90_s16, [#allocation12], %s3524_s19, %s3524_s19, %s3525_s20  }
  0x28   :  { %s3374_s4 = scalar_lea.vmem %s30_s17, 1024  ;;  %p3379_p2 = scmp.lt.s32.totalorder %s30_s17, %s30_s17 }
  0x29   :  { %p3375_p1 = scmp.ne.s32.totalorder %s30_s17, %s3374_s4  ;;  %p3380_p3 = scmp.lt.s32.totalorder %s3374_s4, %s3374_s4 }
  0x2b   :  { %p3381_p4 = por %p3380_p3, %p3379_p2 }
  0x2d   :  { %p3382_p5 = pnand %p3381_p4, %p3375_p1 }
  0x2f   :  { %3385 = shalt.err (!%p3382_p5)
}
  0x30   :  { %s3526_s23 = smov 64   ;;  %s3527_s26 = smov 4  }
  0x31   :  { %35 = dma.hbm_to_vmem [thread:$0]  %s3974_s0, 1024, %s30_s17, [#allocation3], %s3526_s23, %s3526_s23, %s3527_s26  }
  0x32   :  { %s3528_s29 = smov [#allocation7]   ;;  %s3529_s13 = smov [#allocation10]  }
  0x33   :  { %s53_s30 = sshll.u32 %s3528_s29, 4  ;;  %s80_s6 = sshll.u32 %s3529_s13, 4  ;;  %s54_s30 = int_to_ptr.vmem [resolvable:$true] %s53_s30  ;;  %s81_s6 = int_to_ptr.vmem [resolvable:$true] %s80_s6 }
  0x34   :  { %s3394_s14 = scalar_lea.vmem %s54_s30, 4096  ;;  %p3399_p7 = scmp.lt.s32.totalorder %s54_s30, %s54_s30 }
  0x35   :  { %p3395_p6 = scmp.ne.s32.totalorder %s54_s30, %s3394_s14  ;;  %p3400_p8 = scmp.lt.s32.totalorder %s3394_s14, %s3394_s14 }
  0x37   :  { %p3401_p9 = por %p3400_p8, %p3399_p7 }
  0x39   :  { %p3402_p10 = pnand %p3401_p9, %p3395_p6 }
  0x3b   :  { %3405 = shalt.err (!%p3402_p10)
}
  0x3c   :  { %59 = dma.hbm_to_vmem [thread:$0]  %s3976_s2, 4096, %s54_s30, [#allocation6], %s3524_s19, %s3524_s19, %s3525_s20  }
  0x3d   :  { %s3414_s1 = scalar_lea.vmem %s81_s6, 32  ;;  %p3419_p12 = scmp.lt.s32.totalorder %s81_s6, %s81_s6 }
  0x3e   :  { %p3415_p11 = scmp.ne.s32.totalorder %s81_s6, %s3414_s1  ;;  %p3420_p13 = scmp.lt.s32.totalorder %s3414_s1, %s3414_s1 }
  0x40   :  { %p3421_p0 = por %p3420_p13, %p3419_p12 }
  0x42   :  { %p3422_p1 = pnand %p3421_p0, %p3415_p11 }
  0x44   :  { %3425 = shalt.err (!%p3422_p1)
}
  0x45   :  { %83 = dma.hbm_to_vmem [thread:$0]  %s3979_s5, 32, %s81_s6, [#allocation9]  }
  0x46   :  { %s3530_s18 = smov [#allocation13]  }
  0x47   :  { %s103_s21 = sshll.u32 %s3530_s18, 4  ;;  %s104_s21 = int_to_ptr.vmem [resolvable:$true] %s103_s21 }
  0x48   :  { %s3434_s22 = scalar_lea.vmem %s104_s21, 4096  ;;  %p3439_p3 = scmp.lt.s32.totalorder %s104_s21, %s104_s21 }
  0x49   :  { %p3435_p2 = scmp.ne.s32.totalorder %s104_s21, %s3434_s22  ;;  %p3440_p4 = scmp.lt.s32.totalorder %s3434_s22, %s3434_s22 }
  0x4b   :  { %p3441_p5 = por %p3440_p4, %p3439_p3 }
  0x4d   :  { %p3442_p6 = pnand %p3441_p5, %p3435_p2 }
  0x4f   :  { %3445 = shalt.err (!%p3442_p6)
}
  0x50   :  { %109 = dma.hbm_to_vmem [thread:$0]  %s3982_s8, 4096, %s104_s21, [#allocation12], %s3526_s23, %s3526_s23, %s3527_s26  }
  0x51   :  { %3506 = dma.done.wait [#allocation3], 1024  }
  0x52   :  { %3507 = vsyncadd [#allocation3], 4294966272 }
  0x53   :  { %3508 = dma.done.wait [#allocation6], 6144  }
  0x54   :  { %3509 = vsyncadd [#allocation6], 4294961152 }
  0x55   :  { %3510 = dma.done.wait [#allocation9], 8224  }
  0x56   :  { %3511 = vsyncadd [#allocation9], 4294959072 }
  0x57   :  { %3512 = dma.done.wait [#allocation12], 8192  }
  0x58   :  { %3513 = vsyncadd [#allocation12], 4294959104  ;;  %v3531_v0 = vmov 0   ;;  %v2978_v1 = vld [vmem:[#allocation7 + $0xe4] ss:$16 sps:$4 sm:$0xff]   ;;  %v3027_v44 = vld [vmem:[#allocation2 + $0x8] sm:$0xff]  }
  0x59   :  { %444 = vmatprep.mubr.bf16.mxu0 %v3531_v0  ;;  %557 = vmatprep.mubr.bf16.mxu1 %v3531_v0  ;;  %v2980_v2 = vld [vmem:[#allocation7 + $0xec] ss:$16 sps:$4 sm:$0xff]   ;;  %v2982_v3 = vld [vmem:[#allocation7 + $0xe0] ss:$16 sps:$4 sm:$0xff]   ;;  %v2983_v4 = vld [vmem:[#allocation7 + $0xe8] ss:$16 sps:$4 sm:$0xff]  }
  0x5a   :  { %412 = vmatprep.subr.bf16.mxu0 %v2978_v1  ;;  %525 = vmatprep.subr.bf16.mxu1 %v2980_v2  ;;  %v2984_v5 = vld [vmem:[#allocation7 + $0xc4] ss:$16 sps:$4 sm:$0xff]   ;;  %v2986_v6 = vld [vmem:[#allocation7 + $0xcc] ss:$16 sps:$4 sm:$0xff]   ;;  %v2988_v7 = vld [vmem:[#allocation7 + $0xc0] ss:$16 sps:$4 sm:$0xff]  }
  0x5b   :  { %413 = vmatpush1.bf16.msra.mxu0 %v2982_v3  ;;  %526 = vmatpush1.bf16.msra.mxu1 %v2983_v4  ;;  %v2989_v8 = vld [vmem:[#allocation7 + $0xc8] ss:$16 sps:$4 sm:$0xff]   ;;  %v2990_v9 = vld [vmem:[#allocation7 + $0xa4] ss:$16 sps:$4 sm:$0xff]   ;;  %v2992_v10 = vld [vmem:[#allocation7 + $0xac] ss:$16 sps:$4 sm:$0xff]  }
  0x5c   :  { %414 = vmatprep.subr.bf16.mxu0 %v2984_v5  ;;  %527 = vmatprep.subr.bf16.mxu1 %v2986_v6  ;;  %v2994_v11 = vld [vmem:[#allocation7 + $0xa0] ss:$16 sps:$4 sm:$0xff]   ;;  %v2995_v12 = vld [vmem:[#allocation7 + $0xa8] ss:$16 sps:$4 sm:$0xff]   ;;  %v2996_v13 = vld [vmem:[#allocation7 + $0x84] ss:$16 sps:$4 sm:$0xff]  }
  0x5d   :  { %v2998_v14 = vld [vmem:[#allocation7 + $0x8c] ss:$16 sps:$4 sm:$0xff]   ;;  %v3000_v15 = vld [vmem:[#allocation7 + $0x80] ss:$16 sps:$4 sm:$0xff]   ;;  %v3001_v16 = vld [vmem:[#allocation7 + $0x88] ss:$16 sps:$4 sm:$0xff]  }
  0x5e   :  { %v3002_v17 = vld [vmem:[#allocation7 + $0x64] ss:$16 sps:$4 sm:$0xff]   ;;  %v3004_v18 = vld [vmem:[#allocation7 + $0x6c] ss:$16 sps:$4 sm:$0xff]   ;;  %v3006_v19 = vld [vmem:[#allocation7 + $0x60] ss:$16 sps:$4 sm:$0xff]  }
  0x5f   :  { %415 = vmatpush1.bf16.msra.mxu0 %v2988_v7  ;;  %528 = vmatpush1.bf16.msra.mxu1 %v2989_v8  ;;  %v3007_v20 = vld [vmem:[#allocation7 + $0x68] ss:$16 sps:$4 sm:$0xff]   ;;  %v3008_v21 = vld [vmem:[#allocation7 + $0x44] ss:$16 sps:$4 sm:$0xff]   ;;  %v3010_v22 = vld [vmem:[#allocation7 + $0x4c] ss:$16 sps:$4 sm:$0xff]  }
  0x60   :  { %416 = vmatprep.subr.bf16.mxu0 %v2990_v9  ;;  %529 = vmatprep.subr.bf16.mxu1 %v2992_v10  ;;  %v3012_v23 = vld [vmem:[#allocation7 + $0x40] ss:$16 sps:$4 sm:$0xff]   ;;  %v3013_v24 = vld [vmem:[#allocation7 + $0x48] ss:$16 sps:$4 sm:$0xff]   ;;  %v3014_v25 = vld [vmem:[#allocation7 + $0x24] ss:$16 sps:$4 sm:$0xff]  }
  0x61   :  { %v3016_v26 = vld [vmem:[#allocation7 + $0x2c] ss:$16 sps:$4 sm:$0xff]   ;;  %v3018_v27 = vld [vmem:[#allocation7 + $0x20] ss:$16 sps:$4 sm:$0xff]   ;;  %v3019_v28 = vld [vmem:[#allocation7 + $0x28] ss:$16 sps:$4 sm:$0xff]  }
  0x62   :  { %v3020_v29 = vld [vmem:[#allocation7 + $0x4] ss:$16 sps:$4 sm:$0xff]   ;;  %v3022_v30 = vld [vmem:[#allocation7 + $0xc] ss:$16 sps:$4 sm:$0xff]   ;;  %v3024_v31 = vld [vmem:[#allocation7] ss:$16 sps:$4 sm:$0xff]  }
  0x63   :  { %417 = vmatpush1.bf16.msra.mxu0 %v2994_v11  ;;  %530 = vmatpush1.bf16.msra.mxu1 %v2995_v12  ;;  %v3025_v32 = vld [vmem:[#allocation7 + $0x8] ss:$16 sps:$4 sm:$0xff]   ;;  %v3036_v33 = vld [vmem:[#allocation8 + $0x74] ss:$8 sps:$4 sm:$0xff]   ;;  %v3026_v34 = vld [vmem:[#allocation2] sm:$0xff]  }
  0x64   :  { %418 = vmatprep.subr.bf16.mxu0 %v2996_v13  ;;  %531 = vmatprep.subr.bf16.mxu1 %v2998_v14  ;;  %v3039_v35 = vld [vmem:[#allocation8 + $0x174] ss:$8 sps:$4 sm:$0xff]   ;;  %v3034_v36 = vld [vmem:[#allocation8 + $0x70] ss:$8 sps:$4 sm:$0xff]   ;;  %v3042_v38 = vld [vmem:[#allocation8 + $0x64] ss:$8 sps:$4 sm:$0xff]  }
  0x65   :  { %v3037_v37 = vld [vmem:[#allocation8 + $0x170] ss:$8 sps:$4 sm:$0xff]   ;;  %v3045_v39 = vld [vmem:[#allocation8 + $0x164] ss:$8 sps:$4 sm:$0xff]   ;;  %v3040_v40 = vld [vmem:[#allocation8 + $0x60] ss:$8 sps:$4 sm:$0xff]  }
  0x66   :  { %v3043_v41 = vld [vmem:[#allocation8 + $0x160] ss:$8 sps:$4 sm:$0xff]   ;;  %v3048_v42 = vld [vmem:[#allocation8 + $0x54] ss:$8 sps:$4 sm:$0xff]   ;;  %v3046_v45 = vld [vmem:[#allocation8 + $0x50] ss:$8 sps:$4 sm:$0xff]  }
  0x67   :  { %419 = vmatpush1.bf16.msra.mxu0 %v3000_v15  ;;  %532 = vmatpush1.bf16.msra.mxu1 %v3001_v16  ;;  %v3051_v43 = vld [vmem:[#allocation8 + $0x154] ss:$8 sps:$4 sm:$0xff]   ;;  %v3049_v46 = vld [vmem:[#allocation8 + $0x150] ss:$8 sps:$4 sm:$0xff]   ;;  %v3054_v47 = vld [vmem:[#allocation8 + $0x44] ss:$8 sps:$4 sm:$0xff]  }
  0x68   :  { %420 = vmatprep.subr.bf16.mxu0 %v3002_v17  ;;  %533 = vmatprep.subr.bf16.mxu1 %v3004_v18  ;;  %v3057_v48 = vld [vmem:[#allocation8 + $0x144] ss:$8 sps:$4 sm:$0xff]   ;;  %v3052_v49 = vld [vmem:[#allocation8 + $0x40] ss:$8 sps:$4 sm:$0xff]   ;;  %v3060_v51 = vld [vmem:[#allocation8 + $0x34] ss:$8 sps:$4 sm:$0xff]  }
  0x69   :  { %v3055_v50 = vld [vmem:[#allocation8 + $0x140] ss:$8 sps:$4 sm:$0xff]   ;;  %v3063_v52 = vld [vmem:[#allocation8 + $0x134] ss:$8 sps:$4 sm:$0xff]   ;;  %v3058_v54 = vld [vmem:[#allocation8 + $0x30] ss:$8 sps:$4 sm:$0xff]  }
  0x6a   :  { %v3028_v53 = vld [vmem:[#allocation2 + $0x10] sm:$0xff]   ;;  %v3066_v56 = vld [vmem:[#allocation8 + $0x24] ss:$8 sps:$4 sm:$0xff]   ;;  %v3064_v58 = vld [vmem:[#allocation8 + $0x20] ss:$8 sps:$4 sm:$0xff]  }
  0x6b   :  { %421 = vmatpush1.bf16.msra.mxu0 %v3006_v19  ;;  %534 = vmatpush1.bf16.msra.mxu1 %v3007_v20  ;;  %v3061_v55 = vld [vmem:[#allocation8 + $0x130] ss:$8 sps:$4 sm:$0xff]   ;;  %v3069_v57 = vld [vmem:[#allocation8 + $0x124] ss:$8 sps:$4 sm:$0xff]   ;;  %v3067_v59 = vld [vmem:[#allocation8 + $0x120] ss:$8 sps:$4 sm:$0xff]  }
  0x6c   :  { %422 = vmatprep.subr.bf16.mxu0 %v3008_v21  ;;  %535 = vmatprep.subr.bf16.mxu1 %v3010_v22  ;;  %v3072_v60 = vld [vmem:[#allocation8 + $0x14] ss:$8 sps:$4 sm:$0xff]   ;;  %v3070_v63 = vld [vmem:[#allocation8 + $0x10] ss:$8 sps:$4 sm:$0xff]   ;;  %v3078_v2 = vld [vmem:[#allocation8 + $0x4] ss:$8 sps:$4 sm:$0xff]  }
  0x6d   :  { %v3075_v61 = vld [vmem:[#allocation8 + $0x114] ss:$8 sps:$4 sm:$0xff]   ;;  %v3073_v1 = vld [vmem:[#allocation8 + $0x110] ss:$8 sps:$4 sm:$0xff]   ;;  %v3081_v3 = vld [vmem:[#allocation8 + $0x104] ss:$8 sps:$4 sm:$0xff]  }
  0x6e   :  { %v3029_v62 = vld [vmem:[#allocation2 + $0x18] sm:$0xff]   ;;  %v3076_v4 = vld [vmem:[#allocation8] ss:$8 sps:$4 sm:$0xff]   ;;  %v3090_v11 = vld [vmem:[#allocation8 + $0xe4] ss:$8 sps:$4 sm:$0xff]  }
  0x6f   :  { %423 = vmatpush1.bf16.msra.mxu0 %v3012_v23  ;;  %536 = vmatpush1.bf16.msra.mxu1 %v3013_v24  ;;  %v3030_v5 = vld [vmem:[#allocation2 + $0x20] sm:$0xff]   ;;  %v3084_v7 = vld [vmem:[#allocation8 + $0xf4] ss:$8 sps:$4 sm:$0xff]   ;;  %v3082_v9 = vld [vmem:[#allocation8 + $0xf0] ss:$8 sps:$4 sm:$0xff]  }
  0x70   :  { %424 = vmatprep.subr.bf16.mxu0 %v3014_v25  ;;  %537 = vmatprep.subr.bf16.mxu1 %v3016_v26  ;;  %v3079_v6 = vld [vmem:[#allocation8 + $0x100] ss:$8 sps:$4 sm:$0xff]   ;;  %v3087_v8 = vld [vmem:[#allocation8 + $0x1f4] ss:$8 sps:$4 sm:$0xff]   ;;  %v3085_v10 = vld [vmem:[#allocation8 + $0x1f0] ss:$8 sps:$4 sm:$0xff]  }
  0x71   :  { %v3093_v12 = vld [vmem:[#allocation8 + $0x1e4] ss:$8 sps:$4 sm:$0xff]   ;;  %v3088_v13 = vld [vmem:[#allocation8 + $0xe0] ss:$8 sps:$4 sm:$0xff]   ;;  %v3096_v15 = vld [vmem:[#allocation8 + $0xd4] ss:$8 sps:$4 sm:$0xff]  }
  0x72   :  { %v3091_v14 = vld [vmem:[#allocation8 + $0x1e0] ss:$8 sps:$4 sm:$0xff]   ;;  %v3099_v16 = vld [vmem:[#allocation8 + $0x1d4] ss:$8 sps:$4 sm:$0xff]   ;;  %v3094_v18 = vld [vmem:[#allocation8 + $0xd0] ss:$8 sps:$4 sm:$0xff]  }
  0x73   :  { %425 = vmatpush1.bf16.msra.mxu0 %v3018_v27  ;;  %538 = vmatpush1.bf16.msra.mxu1 %v3019_v28  ;;  %v3031_v17 = vld [vmem:[#allocation2 + $0x28] sm:$0xff]   ;;  %v3097_v19 = vld [vmem:[#allocation8 + $0x1d0] ss:$8 sps:$4 sm:$0xff]   ;;  %v3108_v24 = vld [vmem:[#allocation8 + $0xb4] ss:$8 sps:$4 sm:$0xff]  }
  0x74   :  { %426 = vmatprep.subr.bf16.mxu0 %v3020_v29  ;;  %539 = vmatprep.subr.bf16.mxu1 %v3022_v30  ;;  %v3102_v20 = vld [vmem:[#allocation8 + $0xc4] ss:$8 sps:$4 sm:$0xff]   ;;  %v3100_v22 = vld [vmem:[#allocation8 + $0xc0] ss:$8 sps:$4 sm:$0xff]   ;;  %v3111_v25 = vld [vmem:[#allocation8 + $0x1b4] ss:$8 sps:$4 sm:$0xff]  }
  0x75   :  { %v3105_v21 = vld [vmem:[#allocation8 + $0x1c4] ss:$8 sps:$4 sm:$0xff]   ;;  %v3103_v23 = vld [vmem:[#allocation8 + $0x1c0] ss:$8 sps:$4 sm:$0xff]   ;;  %v3032_v26 = vld [vmem:[#allocation2 + $0x30] sm:$0xff]  }
  0x76   :  { %v3106_v27 = vld [vmem:[#allocation8 + $0xb0] ss:$8 sps:$4 sm:$0xff]   ;;  %v3114_v30 = vld [vmem:[#allocation8 + $0xa4] ss:$8 sps:$4 sm:$0xff]  }
  0x77   :  { %427 = vmatpush1.bf16.msra.mxu0 %v3024_v31  ;;  %540 = vmatpush1.bf16.msra.mxu1 %v3025_v32  ;;  %v3109_v28 = vld [vmem:[#allocation8 + $0x1b0] ss:$8 sps:$4 sm:$0xff]   ;;  %v3117_v31 = vld [vmem:[#allocation8 + $0x1a4] ss:$8 sps:$4 sm:$0xff]   ;;  %v3112_v32 = vld [vmem:[#allocation8 + $0xa0] ss:$8 sps:$4 sm:$0xff]  }
  0x78   :  { %1130 = vmatprep.subr.bf16.mxu0 %v3036_v33  ;;  %1243 = vmatprep.subr.bf16.mxu1 %v3039_v35  ;;  %v3033_v29 = vld [vmem:[#allocation2 + $0x38] sm:$0xff]   ;;  %v3115_v33 = vld [vmem:[#allocation8 + $0x1a0] ss:$8 sps:$4 sm:$0xff]  }
  0x79   :  { %v3123_v35 = vld [vmem:[#allocation8 + $0x194] ss:$8 sps:$4 sm:$0xff]  }
  0x7a   :  { %445 = vmatmul.mubr.bf16.vlgmr.msra.gmra.mxu0 %v3026_v34  ;;  %558 = vmatmul.mubr.bf16.vlgmr.msra.gmra.mxu1 %v3026_v34  ;;  %v3120_v34 = vld [vmem:[#allocation8 + $0x94] ss:$8 sps:$4 sm:$0xff]  }
  0x7b   :  { %454 = vmatprep.mubr.bf16.mxu0 %v3531_v0  ;;  %567 = vmatprep.mubr.bf16.mxu1 %v3531_v0 }
  0x7c   :  { %1131 = vmatpush1.bf16.msra.mxu0 %v3034_v36  ;;  %1244 = vmatpush1.bf16.msra.mxu1 %v3037_v37  ;;  %v3118_v36 = vld [vmem:[#allocation8 + $0x90] ss:$8 sps:$4 sm:$0xff]  }
  0x7d   :  { %1132 = vmatprep.subr.bf16.mxu0 %v3042_v38  ;;  %1245 = vmatprep.subr.bf16.mxu1 %v3045_v39  ;;  %v3121_v37 = vld [vmem:[#allocation8 + $0x190] ss:$8 sps:$4 sm:$0xff]   ;;  %v3126_v38 = vld [vmem:[#allocation8 + $0x84] ss:$8 sps:$4 sm:$0xff]  }
  0x7e   :  { %v3129_v39 = vld [vmem:[#allocation8 + $0x184] ss:$8 sps:$4 sm:$0xff]  }
  0x80   :  { %1133 = vmatpush1.bf16.msra.mxu0 %v3040_v40  ;;  %1246 = vmatpush1.bf16.msra.mxu1 %v3043_v41  ;;  %v3124_v40 = vld [vmem:[#allocation8 + $0x80] ss:$8 sps:$4 sm:$0xff]  }
  0x81   :  { %1134 = vmatprep.subr.bf16.mxu0 %v3048_v42  ;;  %1247 = vmatprep.subr.bf16.mxu1 %v3051_v43  ;;  %v3127_v41 = vld [vmem:[#allocation8 + $0x180] ss:$8 sps:$4 sm:$0xff]  }
  0x82   :  { %455 = vmatmul.mubr.bf16.gmra.mxu0 %v3027_v44  ;;  %568 = vmatmul.mubr.bf16.gmra.mxu1 %v3027_v44  ;;  %v3132_v42 = vld [vmem:[#allocation11 + $0xe4] ss:$16 sps:$4 sm:$0xff]   ;;  %v3135_v43 = vld [vmem:[#allocation11 + $0xec] ss:$16 sps:$4 sm:$0xff]   ;;  %v184_v44 = vlaneseq }
  0x83   :  { %464 = vmatprep.mubr.bf16.mxu0 %v3531_v0  ;;  %577 = vmatprep.mubr.bf16.mxu1 %v3531_v0 }
  0x84   :  { %1135 = vmatpush1.bf16.msra.mxu0 %v3046_v45  ;;  %1248 = vmatpush1.bf16.msra.mxu1 %v3049_v46  ;;  %v3649_v45 = vshrl.u32 %v184_v44, 7 }
  0x85   :  { %1136 = vmatprep.subr.bf16.mxu0 %v3054_v47  ;;  %1249 = vmatprep.subr.bf16.mxu1 %v3057_v48 }
  0x86   :  { %v3652_v46 = vsub.s32 1, %v3649_v45  ;;  %v198_v47 = vsub.s32 3, %v3649_v45  ;;  %v3656_v48 = vsub.s32 0, %v3649_v45 }
  0x88   :  { %1137 = vmatpush1.bf16.msra.mxu0 %v3052_v49  ;;  %1250 = vmatpush1.bf16.msra.mxu1 %v3055_v50  ;;  %v194_v49 = vsub.s32 2, %v3649_v45  ;;  %v182_v50 = vld [vmem:[%s3977_s3] sm:$0xf] }
  0x89   :  { %1138 = vmatprep.subr.bf16.mxu0 %v3060_v51  ;;  %1251 = vmatprep.subr.bf16.mxu1 %v3063_v52 }
  0x8a   :  { %465 = vmatmul.mubr.bf16.gmra.mxu0 %v3028_v53  ;;  %578 = vmatmul.mubr.bf16.gmra.mxu1 %v3028_v53  ;;  %v3663_v53 = vrot.slane %v182_v50, %v3652_v46 }
  0x8b   :  { %474 = vmatprep.mubr.bf16.mxu0 %v3531_v0  ;;  %587 = vmatprep.mubr.bf16.mxu1 %v3531_v0 }
  0x8c   :  { %1139 = vmatpush1.bf16.msra.mxu0 %v3058_v54  ;;  %1252 = vmatpush1.bf16.msra.mxu1 %v3061_v55  ;;  %v3667_v54 = vrot.slane %v182_v50, %v198_v47  ;;  %v3670_v55 = vrot.slane %v182_v50, %v3656_v48 }
  0x8d   :  { %1140 = vmatprep.subr.bf16.mxu0 %v3066_v56  ;;  %1253 = vmatprep.subr.bf16.mxu1 %v3069_v57  ;;  %v3674_v56 = vrot.slane %v182_v50, %v194_v49  ;;  %v3139_v50 = vld [vmem:[#allocation11 + $0xc8] ss:$16 sps:$4 sm:$0xff]  }
  0x90   :  { %1141 = vmatpush1.bf16.msra.mxu0 %v3064_v58  ;;  %1254 = vmatpush1.bf16.msra.mxu1 %v3067_v59 }
  0x91   :  { %1142 = vmatprep.subr.bf16.mxu0 %v3072_v60  ;;  %1255 = vmatprep.subr.bf16.mxu1 %v3075_v61 }
  0x92   :  { %475 = vmatmul.mubr.bf16.gmra.mxu0 %v3029_v62  ;;  %588 = vmatmul.mubr.bf16.gmra.mxu1 %v3029_v62 }
  0x93   :  { %484 = vmatprep.mubr.bf16.mxu0 %v3531_v0  ;;  %597 = vmatprep.mubr.bf16.mxu1 %v3531_v0 }
  0x94   :  { %1143 = vmatpush1.bf16.msra.mxu0 %v3070_v63  ;;  %1256 = vmatpush1.bf16.msra.mxu1 %v3073_v1 }
  0x95   :  { %1144 = vmatprep.subr.bf16.mxu0 %v3078_v2  ;;  %1257 = vmatprep.subr.bf16.mxu1 %v3081_v3 }
  0x98   :  { %1145 = vmatpush1.bf16.msra.mxu0 %v3076_v4  ;;  %1258 = vmatpush1.bf16.msra.mxu1 %v3079_v6 }
  0x99   :  { %1146 = vmatprep.subr.bf16.mxu0 %v3084_v7  ;;  %1259 = vmatprep.subr.bf16.mxu1 %v3087_v8 }
  0x9a   :  { %485 = vmatmul.mubr.bf16.gmra.mxu0 %v3030_v5  ;;  %598 = vmatmul.mubr.bf16.gmra.mxu1 %v3030_v5 }
  0x9b   :  { %494 = vmatprep.mubr.bf16.mxu0 %v3531_v0  ;;  %607 = vmatprep.mubr.bf16.mxu1 %v3531_v0 }
  0x9c   :  { %1147 = vmatpush2.bf16.msra.mxu0 %v3082_v9  ;;  %1260 = vmatpush2.bf16.msra.mxu1 %v3085_v10 }
  0x9d   :  { %1148 = vmatprep.subr.bf16.mxu0 %v3090_v11  ;;  %1261 = vmatprep.subr.bf16.mxu1 %v3093_v12 }
  0xa0   :  { %1149 = vmatpush2.bf16.msra.mxu0 %v3088_v13  ;;  %1262 = vmatpush2.bf16.msra.mxu1 %v3091_v14 }
  0xa1   :  { %1150 = vmatprep.subr.bf16.mxu0 %v3096_v15  ;;  %1263 = vmatprep.subr.bf16.mxu1 %v3099_v16 }
  0xa2   :  { %495 = vmatmul.mubr.bf16.gmra.mxu0 %v3031_v17  ;;  %608 = vmatmul.mubr.bf16.gmra.mxu1 %v3031_v17 }
  0xa3   :  { %504 = vmatprep.mubr.bf16.mxu0 %v3531_v0  ;;  %617 = vmatprep.mubr.bf16.mxu1 %v3531_v0 }
  0xa4   :  { %1151 = vmatpush2.bf16.msra.mxu0 %v3094_v18  ;;  %1264 = vmatpush2.bf16.msra.mxu1 %v3097_v19 }
  0xa5   :  { %1152 = vmatprep.subr.bf16.mxu0 %v3102_v20  ;;  %1265 = vmatprep.subr.bf16.mxu1 %v3105_v21 }
  0xa8   :  { %1153 = vmatpush2.bf16.msra.mxu0 %v3100_v22  ;;  %1266 = vmatpush2.bf16.msra.mxu1 %v3103_v23  ;;  %v3130_v22 = vld [vmem:[#allocation11 + $0xe0] ss:$16 sps:$4 sm:$0xff]   ;;  %v3133_v23 = vld [vmem:[#allocation11 + $0xe8] ss:$16 sps:$4 sm:$0xff]  }
  0xa9   :  { %1154 = vmatprep.subr.bf16.mxu0 %v3108_v24  ;;  %1267 = vmatprep.subr.bf16.mxu1 %v3111_v25 }
  0xaa   :  { %505 = vmatmul.mubr.bf16.gmra.mxu0 %v3032_v26  ;;  %618 = vmatmul.mubr.bf16.gmra.mxu1 %v3032_v26 }
  0xab   :  { %514 = vmatprep.mubr.bf16.mxu0 %v3531_v0  ;;  %627 = vmatprep.mubr.bf16.mxu1 %v3531_v0 }
  0xac   :  { %1155 = vmatpush2.bf16.msra.mxu0 %v3106_v27  ;;  %1268 = vmatpush2.bf16.msra.mxu1 %v3109_v28 }
  0xad   :  { %1156 = vmatprep.subr.bf16.mxu0 %v3114_v30  ;;  %1269 = vmatprep.subr.bf16.mxu1 %v3117_v31  ;;  %v3141_v30 = vld [vmem:[#allocation11 + $0xcc] ss:$16 sps:$4 sm:$0xff]  }
  0xb0   :  { %1157 = vmatpush2.bf16.msra.mxu0 %v3112_v32  ;;  %1270 = vmatpush2.bf16.msra.mxu1 %v3115_v33 }
  0xb1   :  { %1158 = vmatprep.subr.bf16.mxu0 %v3120_v34  ;;  %1271 = vmatprep.subr.bf16.mxu1 %v3123_v35 }
  0xb2   :  { %515 = vmatmul.mubr.bf16.gmra.mxu0 %v3033_v29  ;;  %628 = vmatmul.mubr.bf16.gmra.mxu1 %v3033_v29  ;;  %v3138_v29 = vld [vmem:[#allocation11 + $0xc4] ss:$16 sps:$4 sm:$0xff]  }
  0xb4   :  { %1159 = vmatpush2.bf16.msra.mxu0 %v3118_v36  ;;  %1272 = vmatpush2.bf16.msra.mxu1 %v3121_v37 }
  0xb5   :  { %1160 = vmatprep.subr.bf16.mxu0 %v3126_v38  ;;  %1273 = vmatprep.subr.bf16.mxu1 %v3129_v39 }
  0xb8   :  { %1161 = vmatpush2.bf16.msra.mxu0 %v3124_v40  ;;  %1274 = vmatpush2.bf16.msra.mxu1 %v3127_v41  ;;  %v3136_v40 = vld [vmem:[#allocation11 + $0xc0] ss:$16 sps:$4 sm:$0xff]  }
  0xb9   :  { %1674 = vmatprep.subr.bf16.mxu0 %v3132_v42  ;;  %1787 = vmatprep.subr.bf16.mxu1 %v3135_v43 }
 0x13a   :  { %v446_v51 = vpop.f32.mrf.mxu0  ;;  %v559_v52 = vpop.f32.mrf.mxu1 }
 0x13b   :  { %v447_v2 = vadd.f32 %v446_v51, %v3670_v55  ;;  %v560_v3 = vadd.f32 %v559_v52, %v3674_v56  ;;  %v3144_v51 = vld [vmem:[#allocation11 + $0xa4] ss:$16 sps:$4 sm:$0xff]  }
 0x13c   :  { %v448_v57 = vpop.f32.mrf.mxu0  ;;  %v561_v58 = vpop.f32.mrf.mxu1 }
 0x13d   :  { %v449_v61 = vadd.f32 %v448_v57, %v3663_v53  ;;  %v562_v62 = vadd.f32 %v561_v58, %v3667_v54  ;;  %v638_v16 = vmax.f32 %v447_v2, 0.0  ;;  %v640_v17 = vmax.f32 %v560_v3, 0.0  ;;  %v3142_v3 = vld [vmem:[#allocation11 + $0xa0] ss:$16 sps:$4 sm:$0xff]  }
 0x13e   :  { %v450_v59 = vpop.f32.mrf.mxu0  ;;  %v563_v60 = vpop.f32.mrf.mxu1 }
 0x13f   :  { %v451_v63 = vadd.f32 %v450_v59, %v3670_v55  ;;  %v564_v1 = vadd.f32 %v563_v60, %v3674_v56  ;;  %v639_v12 = vmax.f32 %v449_v61, 0.0  ;;  %v641_v13 = vmax.f32 %v562_v62, 0.0 }
 0x140   :  { %v452_v4 = vpop.f32.mrf.mxu0  ;;  %v565_v5 = vpop.f32.mrf.mxu1 }
 0x141   :  { %v453_v6 = vadd.f32 %v452_v4, %v3663_v53  ;;  %v566_v7 = vadd.f32 %v565_v5, %v3667_v54  ;;  %v642_v8 = vmax.f32 %v451_v63, 0.0  ;;  %v644_v9 = vmax.f32 %v564_v1, 0.0  ;;  %v3147_v4 = vld [vmem:[#allocation11 + $0xac] ss:$16 sps:$4 sm:$0xff]  }
 0x142   :  { %v456_v10 = vpop.f32.mrf.mxu0  ;;  %v569_v11 = vpop.f32.mrf.mxu1 }
 0x143   :  { %v643_v14 = vmax.f32 %v453_v6, 0.0  ;;  %v645_v15 = vmax.f32 %v566_v7, 0.0  ;;  %v702_v24 = vpack.c.bf16 %v642_v8, %v638_v16  ;;  %v704_v25 = vpack.c.bf16 %v644_v9, %v640_v17 }
 0x144   :  { %v458_v18 = vpop.f32.mrf.mxu0  ;;  %v571_v19 = vpop.f32.mrf.mxu1  ;;  %v457_v34 = vadd.f32 %v456_v10, %v3670_v55  ;;  %v570_v35 = vadd.f32 %v569_v11, %v3674_v56  ;;  %v3145_v10 = vld [vmem:[#allocation11 + $0xa8] ss:$16 sps:$4 sm:$0xff]   ;;  %v3150_v11 = vld [vmem:[#allocation11 + $0x84] ss:$16 sps:$4 sm:$0xff]  }
 0x145   :  { %v703_v20 = vpack.c.bf16 %v643_v14, %v639_v12  ;;  %v705_v21 = vpack.c.bf16 %v645_v15, %v641_v13  ;;  %v459_v26 = vadd.f32 %v458_v18, %v3663_v53  ;;  %v572_v31 = vadd.f32 %v571_v19, %v3667_v54  ;;  %v3153_v15 = vld [vmem:[#allocation11 + $0x8c] ss:$16 sps:$4 sm:$0xff]  }
 0x146   :  { %v460_v27 = vpop.f32.mrf.mxu0  ;;  %v573_v28 = vpop.f32.mrf.mxu1  ;;  %v646_v60 = vmax.f32 %v457_v34, 0.0  ;;  %v648_v61 = vmax.f32 %v570_v35, 0.0 }
 0x147   :  { %v461_v32 = vadd.f32 %v460_v27, %v3670_v55  ;;  %v574_v33 = vadd.f32 %v573_v28, %v3674_v56  ;;  %1162 = vmatprep.mubr.bf16.mxu0 %v703_v20  ;;  %1275 = vmatprep.mubr.bf16.mxu1 %v705_v21  ;;  %v647_v52 = vmax.f32 %v459_v26, 0.0  ;;  %v649_v57 = vmax.f32 %v572_v31, 0.0  ;;  %v3151_v27 = vld [vmem:[#allocation11 + $0x88] ss:$16 sps:$4 sm:$0xff]  }
 0x148   :  { %v462_v36 = vpop.f32.mrf.mxu0  ;;  %v575_v37 = vpop.f32.mrf.mxu1  ;;  %1163 = vmatmul.mubr.bf16.vlgmr.msra.gmra.mxu0 %v702_v24  ;;  %1276 = vmatmul.mubr.bf16.vlgmr.msra.gmra.mxu1 %v704_v25 }
 0x149   :  { %v463_v38 = vadd.f32 %v462_v36, %v3663_v53  ;;  %v576_v39 = vadd.f32 %v575_v37, %v3667_v54  ;;  %1675 = vmatpush1.bf16.msra.mxu0 %v3130_v22  ;;  %1788 = vmatpush1.bf16.msra.mxu1 %v3133_v23  ;;  %v650_v41 = vmax.f32 %v461_v32, 0.0  ;;  %v652_v42 = vmax.f32 %v574_v33, 0.0  ;;  %v3148_v22 = vld [vmem:[#allocation11 + $0x80] ss:$16 sps:$4 sm:$0xff]  }
 0x14a   :  { %v466_v43 = vpop.f32.mrf.mxu0  ;;  %v579_v44 = vpop.f32.mrf.mxu1  ;;  %1676 = vmatprep.subr.bf16.mxu0 %v3138_v29  ;;  %1789 = vmatprep.subr.bf16.mxu1 %v3141_v30 }
 0x14b   :  { %v651_v58 = vmax.f32 %v463_v38, 0.0  ;;  %v653_v59 = vmax.f32 %v576_v39, 0.0  ;;  %v706_v5 = vpack.c.bf16 %v650_v41, %v646_v60  ;;  %v708_v6 = vpack.c.bf16 %v652_v42, %v648_v61 }
 0x14c   :  { %v468_v62 = vpop.f32.mrf.mxu0  ;;  %v581_v63 = vpop.f32.mrf.mxu1  ;;  %v467_v16 = vadd.f32 %v466_v43, %v3670_v55  ;;  %v580_v17 = vadd.f32 %v579_v44, %v3674_v56 }
 0x14d   :  { %v707_v1 = vpack.c.bf16 %v651_v58, %v647_v52  ;;  %v709_v2 = vpack.c.bf16 %v653_v59, %v649_v57  ;;  %1677 = vmatpush1.bf16.msra.mxu0 %v3136_v40  ;;  %v469_v7 = vadd.f32 %v468_v62, %v3663_v53  ;;  %1790 = vmatpush1.bf16.msra.mxu1 %v3139_v50 }
 0x14e   :  { %v470_v8 = vpop.f32.mrf.mxu0  ;;  %v583_v9 = vpop.f32.mrf.mxu1  ;;  %1678 = vmatprep.subr.bf16.mxu0 %v3144_v51  ;;  %v582_v12 = vadd.f32 %v581_v63, %v3667_v54  ;;  %1791 = vmatprep.subr.bf16.mxu1 %v3147_v4  ;;  %v654_v32 = vmax.f32 %v467_v16, 0.0  ;;  %v656_v33 = vmax.f32 %v580_v17, 0.0 }
 0x14f   :  { %v471_v13 = vadd.f32 %v470_v8, %v3670_v55  ;;  %v584_v14 = vadd.f32 %v583_v9, %v3674_v56  ;;  %1172 = vmatprep.mubr.bf16.mxu0 %v707_v1  ;;  %1285 = vmatprep.mubr.bf16.mxu1 %v709_v2  ;;  %v655_v28 = vmax.f32 %v469_v7, 0.0 }
 0x150   :  { %v472_v18 = vpop.f32.mrf.mxu0  ;;  %v585_v19 = vpop.f32.mrf.mxu1  ;;  %1173 = vmatmul.mubr.bf16.gmra.mxu0 %v706_v5  ;;  %1286 = vmatmul.mubr.bf16.gmra.mxu1 %v708_v6  ;;  %v657_v29 = vmax.f32 %v582_v12, 0.0 }
 0x151   :  { %v473_v20 = vadd.f32 %v472_v18, %v3663_v53  ;;  %v586_v21 = vadd.f32 %v585_v19, %v3667_v54  ;;  %1679 = vmatpush1.bf16.msra.mxu0 %v3142_v3  ;;  %v658_v23 = vmax.f32 %v471_v13, 0.0  ;;  %v660_v24 = vmax.f32 %v584_v14, 0.0  ;;  %1792 = vmatpush1.bf16.msra.mxu1 %v3145_v10 }
 0x152   :  { %v476_v25 = vpop.f32.mrf.mxu0  ;;  %v589_v26 = vpop.f32.mrf.mxu1  ;;  %1680 = vmatprep.subr.bf16.mxu0 %v3150_v11  ;;  %1793 = vmatprep.subr.bf16.mxu1 %v3153_v15 }
 0x153   :  { %v659_v30 = vmax.f32 %v473_v20, 0.0  ;;  %v661_v31 = vmax.f32 %v586_v21, 0.0  ;;  %v710_v38 = vpack.c.bf16 %v658_v23, %v654_v32  ;;  %v712_v39 = vpack.c.bf16 %v660_v24, %v656_v33 }
 0x154   :  { %v478_v34 = vpop.f32.mrf.mxu0  ;;  %v591_v35 = vpop.f32.mrf.mxu1  ;;  %v477_v51 = vadd.f32 %v476_v25, %v3670_v55  ;;  %v590_v52 = vadd.f32 %v589_v26, %v3674_v56 }
 0x155   :  { %v711_v36 = vpack.c.bf16 %v659_v30, %v655_v28  ;;  %v713_v37 = vpack.c.bf16 %v661_v31, %v657_v29  ;;  %1681 = vmatpush1.bf16.msra.mxu0 %v3148_v22  ;;  %v479_v40 = vadd.f32 %v478_v34, %v3663_v53  ;;  %1794 = vmatpush1.bf16.msra.mxu1 %v3151_v27 }
 0x156   :  { %v480_v41 = vpop.f32.mrf.mxu0  ;;  %v593_v42 = vpop.f32.mrf.mxu1  ;;  %v592_v43 = vadd.f32 %v591_v35, %v3667_v54  ;;  %v662_v6 = vmax.f32 %v477_v51, 0.0  ;;  %v664_v7 = vmax.f32 %v590_v52, 0.0 }
 0x157   :  { %v481_v44 = vadd.f32 %v480_v41, %v3670_v55  ;;  %v594_v50 = vadd.f32 %v593_v42, %v3674_v56  ;;  %1182 = vmatprep.mubr.bf16.mxu0 %v711_v36  ;;  %1295 = vmatprep.mubr.bf16.mxu1 %v713_v37  ;;  %v663_v2 = vmax.f32 %v479_v40, 0.0 }
 0x158   :  { %v482_v57 = vpop.f32.mrf.mxu0  ;;  %v595_v58 = vpop.f32.mrf.mxu1  ;;  %1183 = vmatmul.mubr.bf16.gmra.mxu0 %v710_v38  ;;  %1296 = vmatmul.mubr.bf16.gmra.mxu1 %v712_v39  ;;  %v665_v3 = vmax.f32 %v592_v43, 0.0 }
 0x159   :  { %v483_v59 = vadd.f32 %v482_v57, %v3663_v53  ;;  %v596_v60 = vadd.f32 %v595_v58, %v3667_v54  ;;  %v666_v61 = vmax.f32 %v481_v44, 0.0  ;;  %v668_v62 = vmax.f32 %v594_v50, 0.0 }
 0x15a   :  { %v486_v63 = vpop.f32.mrf.mxu0  ;;  %v599_v1 = vpop.f32.mrf.mxu1 }
 0x15b   :  { %v667_v4 = vmax.f32 %v483_v59, 0.0  ;;  %v669_v5 = vmax.f32 %v596_v60, 0.0  ;;  %v714_v12 = vpack.c.bf16 %v666_v61, %v662_v6  ;;  %v716_v13 = vpack.c.bf16 %v668_v62, %v664_v7 }
 0x15c   :  { %v488_v8 = vpop.f32.mrf.mxu0  ;;  %v601_v9 = vpop.f32.mrf.mxu1  ;;  %v487_v20 = vadd.f32 %v486_v63, %v3670_v55  ;;  %v600_v21 = vadd.f32 %v599_v1, %v3674_v56 }
 0x15d   :  { %v715_v10 = vpack.c.bf16 %v667_v4, %v663_v2  ;;  %v717_v11 = vpack.c.bf16 %v669_v5, %v665_v3  ;;  %v489_v14 = vadd.f32 %v488_v8, %v3663_v53  ;;  %v602_v17 = vadd.f32 %v601_v9, %v3667_v54 }
 0x15e   :  { %v490_v15 = vpop.f32.mrf.mxu0  ;;  %v603_v16 = vpop.f32.mrf.mxu1  ;;  %v670_v34 = vmax.f32 %v487_v20, 0.0  ;;  %v672_v35 = vmax.f32 %v600_v21, 0.0 }
 0x15f   :  { %v491_v18 = vadd.f32 %v490_v15, %v3670_v55  ;;  %v604_v19 = vadd.f32 %v603_v16, %v3674_v56  ;;  %1192 = vmatprep.mubr.bf16.mxu0 %v715_v10  ;;  %1305 = vmatprep.mubr.bf16.mxu1 %v717_v11  ;;  %v671_v30 = vmax.f32 %v489_v14, 0.0  ;;  %v673_v31 = vmax.f32 %v602_v17, 0.0 }
 0x160   :  { %v492_v22 = vpop.f32.mrf.mxu0  ;;  %v605_v23 = vpop.f32.mrf.mxu1  ;;  %1193 = vmatmul.mubr.bf16.gmra.mxu0 %v714_v12  ;;  %1306 = vmatmul.mubr.bf16.gmra.mxu1 %v716_v13 }
 0x161   :  { %v493_v24 = vadd.f32 %v492_v22, %v3663_v53  ;;  %v606_v25 = vadd.f32 %v605_v23, %v3667_v54  ;;  %v674_v26 = vmax.f32 %v491_v18, 0.0  ;;  %v676_v27 = vmax.f32 %v604_v19, 0.0 }
 0x162   :  { %v496_v28 = vpop.f32.mrf.mxu0  ;;  %v609_v29 = vpop.f32.mrf.mxu1 }
 0x163   :  { %v675_v32 = vmax.f32 %v493_v24, 0.0  ;;  %v677_v33 = vmax.f32 %v606_v25, 0.0  ;;  %v718_v40 = vpack.c.bf16 %v674_v26, %v670_v34  ;;  %v720_v41 = vpack.c.bf16 %v676_v27, %v672_v35 }
 0x164   :  { %v498_v36 = vpop.f32.mrf.mxu0  ;;  %v611_v37 = vpop.f32.mrf.mxu1  ;;  %v497_v57 = vadd.f32 %v496_v28, %v3670_v55  ;;  %v610_v58 = vadd.f32 %v609_v29, %v3674_v56 }
 0x165   :  { %v719_v38 = vpack.c.bf16 %v675_v32, %v671_v30  ;;  %v721_v39 = vpack.c.bf16 %v677_v33, %v673_v31  ;;  %v499_v42 = vadd.f32 %v498_v36, %v3663_v53  ;;  %v612_v50 = vadd.f32 %v611_v37, %v3667_v54 }
 0x166   :  { %v500_v43 = vpop.f32.mrf.mxu0  ;;  %v613_v44 = vpop.f32.mrf.mxu1  ;;  %v678_v8 = vmax.f32 %v497_v57, 0.0  ;;  %v680_v9 = vmax.f32 %v610_v58, 0.0 }
 0x167   :  { %v501_v51 = vadd.f32 %v500_v43, %v3670_v55  ;;  %v614_v52 = vadd.f32 %v613_v44, %v3674_v56  ;;  %1202 = vmatprep.mubr.bf16.mxu0 %v719_v38  ;;  %1315 = vmatprep.mubr.bf16.mxu1 %v721_v39  ;;  %v679_v4 = vmax.f32 %v499_v42, 0.0  ;;  %v681_v5 = vmax.f32 %v612_v50, 0.0 }
 0x168   :  { %v502_v59 = vpop.f32.mrf.mxu0  ;;  %v615_v60 = vpop.f32.mrf.mxu1  ;;  %1203 = vmatmul.mubr.bf16.gmra.mxu0 %v718_v40  ;;  %1316 = vmatmul.mubr.bf16.gmra.mxu1 %v720_v41 }
 0x169   :  { %v503_v61 = vadd.f32 %v502_v59, %v3663_v53  ;;  %v616_v62 = vadd.f32 %v615_v60, %v3667_v54  ;;  %v682_v63 = vmax.f32 %v501_v51, 0.0  ;;  %v684_v1 = vmax.f32 %v614_v52, 0.0 }
 0x16a   :  { %v506_v2 = vpop.f32.mrf.mxu0  ;;  %v619_v3 = vpop.f32.mrf.mxu1 }
 0x16b   :  { %v683_v6 = vmax.f32 %v503_v61, 0.0  ;;  %v685_v7 = vmax.f32 %v616_v62, 0.0  ;;  %v722_v14 = vpack.c.bf16 %v682_v63, %v678_v8  ;;  %v724_v15 = vpack.c.bf16 %v684_v1, %v680_v9 }
 0x16c   :  { %v508_v10 = vpop.f32.mrf.mxu0  ;;  %v621_v11 = vpop.f32.mrf.mxu1  ;;  %v507_v22 = vadd.f32 %v506_v2, %v3670_v55  ;;  %v620_v23 = vadd.f32 %v619_v3, %v3674_v56 }
 0x16d   :  { %v723_v12 = vpack.c.bf16 %v683_v6, %v679_v4  ;;  %v725_v13 = vpack.c.bf16 %v685_v7, %v681_v5  ;;  %v509_v16 = vadd.f32 %v508_v10, %v3663_v53  ;;  %v622_v19 = vadd.f32 %v621_v11, %v3667_v54 }
 0x16e   :  { %v510_v17 = vpop.f32.mrf.mxu0  ;;  %v623_v18 = vpop.f32.mrf.mxu1  ;;  %v686_v36 = vmax.f32 %v507_v22, 0.0  ;;  %v688_v37 = vmax.f32 %v620_v23, 0.0  ;;  %v3174_v22 = vld [vmem:[#allocation11 + $0x4] ss:$16 sps:$4 sm:$0xff]   ;;  %v3177_v23 = vld [vmem:[#allocation11 + $0xc] ss:$16 sps:$4 sm:$0xff]  }
 0x16f   :  { %v511_v20 = vadd.f32 %v510_v17, %v3670_v55  ;;  %v624_v21 = vadd.f32 %v623_v18, %v3674_v56  ;;  %1212 = vmatprep.mubr.bf16.mxu0 %v723_v12  ;;  %1325 = vmatprep.mubr.bf16.mxu1 %v725_v13  ;;  %v687_v32 = vmax.f32 %v509_v16, 0.0  ;;  %v689_v33 = vmax.f32 %v622_v19, 0.0  ;;  %v3157_v12 = vld [vmem:[#allocation11 + $0x68] ss:$16 sps:$4 sm:$0xff]   ;;  %v3159_v13 = vld [vmem:[#allocation11 + $0x6c] ss:$16 sps:$4 sm:$0xff]  }
 0x170   :  { %v512_v24 = vpop.f32.mrf.mxu0  ;;  %v625_v25 = vpop.f32.mrf.mxu1  ;;  %1213 = vmatmul.mubr.bf16.gmra.mxu0 %v722_v14  ;;  %1326 = vmatmul.mubr.bf16.gmra.mxu1 %v724_v15  ;;  %v3160_v14 = vld [vmem:[#allocation11 + $0x40] ss:$16 sps:$4 sm:$0xff]   ;;  %v3162_v15 = vld [vmem:[#allocation11 + $0x44] ss:$16 sps:$4 sm:$0xff]   ;;  %v3163_v16 = vld [vmem:[#allocation11 + $0x48] ss:$16 sps:$4 sm:$0xff]  }
 0x171   :  { %v513_v26 = vadd.f32 %v512_v24, %v3663_v53  ;;  %v626_v27 = vadd.f32 %v625_v25, %v3667_v54  ;;  %v690_v28 = vmax.f32 %v511_v20, 0.0  ;;  %v692_v29 = vmax.f32 %v624_v21, 0.0  ;;  %1795 = vmatprep.subr.bf16.mxu1 %v3159_v13  ;;  %v3165_v17 = vld [vmem:[#allocation11 + $0x4c] ss:$16 sps:$4 sm:$0xff]   ;;  %v3168_v18 = vld [vmem:[#allocation11 + $0x24] ss:$16 sps:$4 sm:$0xff]  }
 0x172   :  { %v516_v30 = vpop.f32.mrf.mxu0  ;;  %v629_v31 = vpop.f32.mrf.mxu1  ;;  %1796 = vmatpush1.bf16.msra.mxu1 %v3157_v12  ;;  %v3171_v19 = vld [vmem:[#allocation11 + $0x2c] ss:$16 sps:$4 sm:$0xff]   ;;  %v3166_v20 = vld [vmem:[#allocation11 + $0x20] ss:$16 sps:$4 sm:$0xff]   ;;  %v3169_v21 = vld [vmem:[#allocation11 + $0x28] ss:$16 sps:$4 sm:$0xff]  }
 0x173   :  { %v691_v34 = vmax.f32 %v513_v26, 0.0  ;;  %v693_v35 = vmax.f32 %v626_v27, 0.0  ;;  %v726_v42 = vpack.c.bf16 %v690_v28, %v686_v36  ;;  %v728_v43 = vpack.c.bf16 %v692_v29, %v688_v37  ;;  %1797 = vmatprep.subr.bf16.mxu1 %v3165_v17  ;;  %v3172_v24 = vld [vmem:[#allocation11] ss:$16 sps:$4 sm:$0xff]   ;;  %v3175_v25 = vld [vmem:[#allocation11 + $0x8] ss:$16 sps:$4 sm:$0xff]  }
 0x174   :  { %v518_v38 = vpop.f32.mrf.mxu0  ;;  %v631_v39 = vpop.f32.mrf.mxu1  ;;  %v517_v59 = vadd.f32 %v516_v30, %v3670_v55  ;;  %v630_v60 = vadd.f32 %v629_v31, %v3674_v56  ;;  %v3178_v26 = vld [vmem:[#allocation13 + $0x78] sm:$0xff]  }
 0x175   :  { %v727_v40 = vpack.c.bf16 %v691_v34, %v687_v32  ;;  %v729_v41 = vpack.c.bf16 %v693_v35, %v689_v33  ;;  %v519_v44 = vadd.f32 %v518_v38, %v3663_v53  ;;  %v632_v52 = vadd.f32 %v631_v39, %v3667_v54  ;;  %v3180_v27 = vld [vmem:[#allocation13 + $0xf8] sm:$0xff]  }
 0x176   :  { %v520_v50 = vpop.f32.mrf.mxu0  ;;  %v633_v51 = vpop.f32.mrf.mxu1  ;;  %v694_v8 = vmax.f32 %v517_v59, 0.0  ;;  %v696_v9 = vmax.f32 %v630_v60, 0.0  ;;  %1798 = vmatpush1.bf16.msra.mxu1 %v3163_v16  ;;  %v798_v28 = vld [vmem:[#allocation10] sm:$0x3] }
 0x177   :  { %v521_v57 = vadd.f32 %v520_v50, %v3670_v55  ;;  %v634_v58 = vadd.f32 %v633_v51, %v3674_v56  ;;  %1222 = vmatprep.mubr.bf16.mxu0 %v727_v40  ;;  %1335 = vmatprep.mubr.bf16.mxu1 %v729_v41  ;;  %v695_v4 = vmax.f32 %v519_v44, 0.0  ;;  %v697_v5 = vmax.f32 %v632_v52, 0.0 }
 0x178   :  { %v522_v61 = vpop.f32.mrf.mxu0  ;;  %v635_v62 = vpop.f32.mrf.mxu1  ;;  %1223 = vmatmul.mubr.bf16.gmra.mxu0 %v726_v42  ;;  %1336 = vmatmul.mubr.bf16.gmra.mxu1 %v728_v43  ;;  %v3743_v29 = vrot.slane %v798_v28, %v3656_v48  ;;  %v3746_v30 = vrot.slane %v798_v28, %v3652_v46 }
 0x179   :  { %v523_v63 = vadd.f32 %v522_v61, %v3663_v53  ;;  %v636_v1 = vadd.f32 %v635_v62, %v3667_v54  ;;  %v698_v2 = vmax.f32 %v521_v57, 0.0  ;;  %v700_v3 = vmax.f32 %v634_v58, 0.0  ;;  %v3154_v53 = vld [vmem:[#allocation11 + $0x60] ss:$16 sps:$4 sm:$0xff]   ;;  %v3156_v54 = vld [vmem:[#allocation11 + $0x64] ss:$16 sps:$4 sm:$0xff]   ;;  %1799 = vmatprep.subr.bf16.mxu1 %v3171_v19 }
 0x17a   :  { %1682 = vmatprep.subr.bf16.mxu0 %v3156_v54  ;;  %1800 = vmatpush1.bf16.msra.mxu1 %v3169_v21 }
 0x17b   :  { %v699_v6 = vmax.f32 %v523_v63, 0.0  ;;  %v701_v7 = vmax.f32 %v636_v1, 0.0  ;;  %v730_v11 = vpack.c.bf16 %v698_v2, %v694_v8  ;;  %v732_v56 = vpack.c.bf16 %v700_v3, %v696_v9  ;;  %1683 = vmatpush1.bf16.msra.mxu0 %v3154_v53  ;;  %1801 = vmatprep.subr.bf16.mxu1 %v3177_v23 }
 0x17c   :  { %1684 = vmatprep.subr.bf16.mxu0 %v3162_v15 }
 0x17d   :  { %v731_v10 = vpack.c.bf16 %v699_v6, %v695_v4  ;;  %v733_v55 = vpack.c.bf16 %v701_v7, %v697_v5 }
 0x17e   :  { %1802 = vmatpush1.bf16.msra.mxu1 %v3175_v25 }
 0x17f   :  { %1232 = vmatprep.mubr.bf16.mxu0 %v731_v10  ;;  %1345 = vmatprep.mubr.bf16.mxu1 %v733_v55 }
 0x180   :  { %1233 = vmatmul.mubr.bf16.gmra.mxu0 %v730_v11  ;;  %1346 = vmatmul.mubr.bf16.gmra.mxu1 %v732_v56 }
 0x181   :  { %1706 = vmatprep.mubr.bf16.mxu0 %v3531_v0  ;;  %1819 = vmatprep.mubr.bf16.mxu1 %v3531_v0 }
 0x182   :  { %1685 = vmatpush1.bf16.msra.mxu0 %v3160_v14  ;;  %2897 = vmatprep.subr.bf16.mxu1 %v3180_v27 }
 0x183   :  { %1686 = vmatprep.subr.bf16.mxu0 %v3168_v18 }
 0x186   :  { %1687 = vmatpush1.bf16.msra.mxu0 %v3166_v20 }
 0x187   :  { %1688 = vmatprep.subr.bf16.mxu0 %v3174_v22 }
 0x18a   :  { %1689 = vmatpush1.bf16.msra.mxu0 %v3172_v24 }
 0x18b   :  { %2833 = vmatprep.subr.bf16.mxu0 %v3178_v26 }
 0x208   :  { %v1164_v31 = vpop.f32.mrf.mxu0  ;;  %v1277_v32 = vpop.f32.mrf.mxu1 }
 0x209   :  { %v1165_v33 = vadd.f32 %v1164_v31, %v3743_v29 }
 0x20a   :  { %v1166_v34 = vpop.f32.mrf.mxu0  ;;  %v1279_v35 = vpop.f32.mrf.mxu1 }
 0x20b   :  { %v3749_v36 = vadd.f32 %v1277_v32, %v1165_v33  ;;  %v1167_v37 = vadd.f32 %v1166_v34, %v3746_v30 }
 0x20c   :  { %v1168_v38 = vpop.f32.mrf.mxu0  ;;  %v1281_v39 = vpop.f32.mrf.mxu1 }
 0x20d   :  { %2565 = vst [vmem:[#allocation15] sm:$0xff] %v3749_v36  ;;  %v1280_v40 = vadd.f32 %v1279_v35, %v1167_v37  ;;  %v1169_v41 = vadd.f32 %v1168_v38, %v3743_v29  ;;  %v1404_v38 = vld [vmem:[#allocation5] sm:$0xff] }
 0x20e   :  { %v1170_v42 = vpop.f32.mrf.mxu0  ;;  %v1283_v43 = vpop.f32.mrf.mxu1 }
 0x20f   :  { %v1356_v44 = vmul.f32 0.5, %v1280_v40  ;;  %2581 = vst [vmem:[#allocation17] sm:$0xff] %v1280_v40  ;;  %v3754_v50 = vadd.f32 %v1281_v39, %v1169_v41  ;;  %v1171_v51 = vadd.f32 %v1170_v42, %v3746_v30  ;;  %v1405_v41 = vld [vmem:[#allocation5 + $0x8] sm:$0xff] }
 0x210   :  { %v1174_v52 = vpop.f32.mrf.mxu0  ;;  %v1287_v57 = vpop.f32.mrf.mxu1 }
 0x211   :  { %v1372_v58 = vmul.f32 1.442695, %v1356_v44  ;;  %2566 = vst [vmem:[#allocation15 + $0x8] sm:$0xff] %v3754_v50  ;;  %v1284_v59 = vadd.f32 %v1283_v43, %v1171_v51  ;;  %v1175_v60 = vadd.f32 %v1174_v52, %v3743_v29 }
 0x212   :  { %v1176_v61 = vpop.f32.mrf.mxu0  ;;  %v1289_v62 = vpop.f32.mrf.mxu1 }
 0x213   :  { %v1357_v63 = vmul.f32 0.5, %v1284_v59  ;;  %2582 = vst [vmem:[#allocation17 + $0x8] sm:$0xff] %v1284_v59  ;;  %v3759_v1 = vadd.f32 %v1287_v57, %v1175_v60  ;;  %v1177_v2 = vadd.f32 %v1176_v61, %v3746_v30  ;;  %3210 = vpow2.f32 %v1372_v58 }
 0x214   :  { %v1178_v3 = vpop.f32.mrf.mxu0  ;;  %v1291_v4 = vpop.f32.mrf.mxu1 }
 0x215   :  { %v1374_v5 = vmul.f32 1.442695, %v1357_v63  ;;  %2567 = vst [vmem:[#allocation15 + $0x10] sm:$0xff] %v3759_v1  ;;  %v1290_v6 = vadd.f32 %v1289_v62, %v1177_v2  ;;  %v1179_v7 = vadd.f32 %v1178_v3, %v3743_v29 }
 0x216   :  { %v1180_v8 = vpop.f32.mrf.mxu0  ;;  %v1293_v9 = vpop.f32.mrf.mxu1 }
 0x217   :  { %3212 = vpow2.f32 %v1374_v5  ;;  %v1358_v10 = vmul.f32 0.5, %v1290_v6  ;;  %2583 = vst [vmem:[#allocation17 + $0x10] sm:$0xff] %v1290_v6  ;;  %v3764_v55 = vadd.f32 %v1291_v4, %v1179_v7  ;;  %v1181_v11 = vadd.f32 %v1180_v8, %v3746_v30 }
 0x218   :  { %v1184_v56 = vpop.f32.mrf.mxu0  ;;  %v1297_v53 = vpop.f32.mrf.mxu1 }
 0x219   :  { %v1376_v54 = vmul.f32 1.442695, %v1358_v10  ;;  %2568 = vst [vmem:[#allocation15 + $0x18] sm:$0xff] %v3764_v55  ;;  %v1294_v12 = vadd.f32 %v1293_v9, %v1181_v11  ;;  %v1185_v13 = vadd.f32 %v1184_v56, %v3743_v29 }
 0x21a   :  { %v1186_v14 = vpop.f32.mrf.mxu0  ;;  %v1299_v15 = vpop.f32.mrf.mxu1 }
 0x21b   :  { %v1359_v16 = vmul.f32 0.5, %v1294_v12  ;;  %2584 = vst [vmem:[#allocation17 + $0x18] sm:$0xff] %v1294_v12  ;;  %v3769_v17 = vadd.f32 %v1297_v53, %v1185_v13  ;;  %v1187_v18 = vadd.f32 %v1186_v14, %v3746_v30  ;;  %3214 = vpow2.f32 %v1376_v54  ;;  %v1406_v54 = vld [vmem:[#allocation5 + $0x10] sm:$0xff] }
 0x21c   :  { %v1188_v19 = vpop.f32.mrf.mxu0  ;;  %v1301_v20 = vpop.f32.mrf.mxu1 }
 0x21d   :  { %v1378_v21 = vmul.f32 1.442695, %v1359_v16  ;;  %2569 = vst [vmem:[#allocation15 + $0x20] sm:$0xff] %v3769_v17  ;;  %v1300_v22 = vadd.f32 %v1299_v15, %v1187_v18  ;;  %v1189_v23 = vadd.f32 %v1188_v19, %v3743_v29  ;;  %v1407_v15 = vld [vmem:[#allocation5 + $0x18] sm:$0xff] }
 0x21e   :  { %v1190_v24 = vpop.f32.mrf.mxu0  ;;  %v1303_v25 = vpop.f32.mrf.mxu1  ;;  %v3179_v16 = vld [vmem:[#allocation13 + $0x38] sm:$0xff]  }
 0x21f   :  { %3216 = vpow2.f32 %v1378_v21  ;;  %v1360_v26 = vmul.f32 0.5, %v1300_v22  ;;  %2585 = vst [vmem:[#allocation17 + $0x20] sm:$0xff] %v1300_v22  ;;  %v3774_v27 = vadd.f32 %v1301_v20, %v1189_v23  ;;  %v1191_v28 = vadd.f32 %v1190_v24, %v3746_v30  ;;  %v3181_v18 = vld [vmem:[#allocation13 + $0xb8] sm:$0xff]   ;;  %v3184_v21 = vld [vmem:[#allocation13 + $0xf0] sm:$0xff]  }
 0x220   :  { %v1194_v31 = vpop.f32.mrf.mxu0  ;;  %v1307_v32 = vpop.f32.mrf.mxu1 }
 0x221   :  { %v3211_v33 = vpop.eup %3210  ;;  %v1380_v34 = vmul.f32 1.442695, %v1360_v26  ;;  %2570 = vst [vmem:[#allocation15 + $0x28] sm:$0xff] %v3774_v27  ;;  %v1304_v35 = vadd.f32 %v1303_v25, %v1191_v28  ;;  %v1195_v37 = vadd.f32 %v1194_v31, %v3743_v29 }
 0x222   :  { %v1196_v39 = vpop.f32.mrf.mxu0  ;;  %v1309_v40 = vpop.f32.mrf.mxu1  ;;  %v1420_v58 = vmul.f32 %v3211_v33, %v1404_v38 }
 0x223   :  { %v1361_v42 = vmul.f32 0.5, %v1304_v35  ;;  %2586 = vst [vmem:[#allocation17 + $0x28] sm:$0xff] %v1304_v35  ;;  %v3779_v43 = vadd.f32 %v1307_v32, %v1195_v37  ;;  %v1197_v44 = vadd.f32 %v1196_v39, %v3746_v30  ;;  %3218 = vpow2.f32 %v1380_v34  ;;  %v3183_v35 = vld [vmem:[#allocation13 + $0x30] sm:$0xff]  }
 0x224   :  { %v3213_v51 = vpop.eup %3212  ;;  %v1198_v52 = vpop.f32.mrf.mxu0  ;;  %v1436_v8 = vadd.f32 %v1420_v58, %v3749_v36  ;;  %v3185_v37 = vld [vmem:[#allocation13 + $0xb0] sm:$0xff]  }
 0x225   :  { %v1311_v57 = vpop.f32.mrf.mxu1  ;;  %v1382_v59 = vmul.f32 1.442695, %v1361_v42  ;;  %2571 = vst [vmem:[#allocation15 + $0x30] sm:$0xff] %v3779_v43  ;;  %v1310_v60 = vadd.f32 %v1309_v40, %v1197_v44  ;;  %v1199_v61 = vadd.f32 %v1198_v52, %v3743_v29  ;;  %v1421_v62 = vmul.f32 %v3213_v51, %v1405_v41  ;;  %v3186_v41 = vld [vmem:[#allocation13 + $0x68] sm:$0xff]  }
 0x226   :  { %v1200_v63 = vpop.f32.mrf.mxu0  ;;  %v3188_v42 = vld [vmem:[#allocation13 + $0xe8] sm:$0xff]  }
 0x227   :  { %v1313_v2 = vpop.f32.mrf.mxu1  ;;  %3220 = vpow2.f32 %v1382_v59  ;;  %v1362_v3 = vmul.f32 0.5, %v1310_v60  ;;  %2587 = vst [vmem:[#allocation17 + $0x30] sm:$0xff] %v1310_v60  ;;  %v3784_v4 = vadd.f32 %v1311_v57, %v1199_v61  ;;  %v1201_v5 = vadd.f32 %v1200_v63, %v3746_v30 }
 0x228   :  { %v1204_v6 = vpop.f32.mrf.mxu0  ;;  %v1437_v9 = vadd.f32 %v1421_v62, %v3754_v50  ;;  %v3215_v10 = vpop.eup %3214  ;;  %v3182_v50 = vld [vmem:[#allocation13 + $0x70] sm:$0xff]   ;;  %v1408_v62 = vld [vmem:[#allocation5 + $0x20] sm:$0xff] }
 0x229   :  { %v1317_v7 = vpop.f32.mrf.mxu1  ;;  %v1384_v11 = vmul.f32 1.442695, %v1362_v3  ;;  %2572 = vst [vmem:[#allocation15 + $0x38] sm:$0xff] %v3784_v4  ;;  %v1314_v56 = vadd.f32 %v1313_v2, %v1201_v5  ;;  %v1205_v53 = vadd.f32 %v1204_v6, %v3743_v29  ;;  %v1422_v25 = vmul.f32 %v3215_v10, %v1406_v54  ;;  %v1409_v5 = vld [vmem:[#allocation5 + $0x28] sm:$0xff] }
 0x22a   :  { %v1206_v12 = vpop.f32.mrf.mxu0  ;;  %v1452_v14 = vpack.c.bf16 %v1437_v9, %v1436_v8  ;;  %v3187_v6 = vld [vmem:[#allocation13 + $0x28] sm:$0xff]   ;;  %v3190_v9 = vld [vmem:[#allocation13 + $0x60] sm:$0xff]  }
 0x22b   :  { %v1319_v13 = vpop.f32.mrf.mxu1  ;;  %v1363_v19 = vmul.f32 0.5, %v1314_v56  ;;  %2588 = vst [vmem:[#allocation17 + $0x38] sm:$0xff] %v1314_v56  ;;  %v3791_v20 = vadd.f32 %v1317_v7, %v1205_v53  ;;  %v1207_v36 = vadd.f32 %v1206_v12, %v3746_v30  ;;  %3222 = vpow2.f32 %v1384_v11  ;;  %v3189_v7 = vld [vmem:[#allocation13 + $0xa8] sm:$0xff]   ;;  %v3192_v10 = vld [vmem:[#allocation13 + $0xe0] sm:$0xff]  }
 0x22c   :  { %v3217_v22 = vpop.eup %3216  ;;  %1707 = vmatmul.mubr.bf16.vlgmr.msra.gmra.mxu0 %v1452_v14  ;;  %1820 = vmatmul.mubr.bf16.vlgmr.msra.gmra.mxu1 %v1452_v14  ;;  %v1208_v23 = vpop.f32.mrf.mxu0  ;;  %v1438_v52 = vadd.f32 %v1422_v25, %v3759_v1 }
 0x22d   :  { %v1321_v24 = vpop.f32.mrf.mxu1  ;;  %v1386_v26 = vmul.f32 1.442695, %v1363_v19  ;;  %2573 = vst [vmem:[#allocation15 + $0x40] sm:$0xff] %v3791_v20  ;;  %v1320_v28 = vadd.f32 %v1319_v13, %v1207_v36  ;;  %v1209_v31 = vadd.f32 %v1208_v23, %v3743_v29  ;;  %1716 = vmatprep.mubr.bf16.mxu0 %v3531_v0  ;;  %1829 = vmatprep.mubr.bf16.mxu1 %v3531_v0  ;;  %v3191_v19 = vld [vmem:[#allocation13 + $0x20] sm:$0xff]   ;;  %v3194_v23 = vld [vmem:[#allocation13 + $0x58] sm:$0xff]  }
 0x22e   :  { %v1423_v32 = vmul.f32 %v3217_v22, %v1407_v15  ;;  %v1210_v33 = vpop.f32.mrf.mxu0  ;;  %2834 = vmatpush3.bf16.msra.mxu0 %v3179_v16  ;;  %2898 = vmatpush3.bf16.msra.mxu1 %v3181_v18  ;;  %v3193_v36 = vld [vmem:[#allocation13 + $0xa0] sm:$0xff]  }
 0x22f   :  { %v1323_v34 = vpop.f32.mrf.mxu1  ;;  %3224 = vpow2.f32 %v1386_v26  ;;  %v1364_v38 = vmul.f32 0.5, %v1320_v28  ;;  %2589 = vst [vmem:[#allocation17 + $0x40] sm:$0xff] %v1320_v28  ;;  %v3798_v39 = vadd.f32 %v1321_v24, %v1209_v31  ;;  %v1211_v40 = vadd.f32 %v1210_v33, %v3746_v30  ;;  %2835 = vmatprep.subr.bf16.mxu0 %v3182_v50  ;;  %2899 = vmatprep.subr.bf16.mxu1 %v3184_v21  ;;  %v3196_v24 = vld [vmem:[#allocation13 + $0xd8] sm:$0xff]  }
 0x230   :  { %v1214_v44 = vpop.f32.mrf.mxu0  ;;  %v1439_v57 = vadd.f32 %v1423_v32, %v3764_v55  ;;  %v3219_v58 = vpop.eup %3218 }
 0x231   :  { %v1327_v51 = vpop.f32.mrf.mxu1  ;;  %v1388_v59 = vmul.f32 1.442695, %v1364_v38  ;;  %2574 = vst [vmem:[#allocation15 + $0x48] sm:$0xff] %v3798_v39  ;;  %v1324_v60 = vadd.f32 %v1323_v34, %v1211_v40  ;;  %v1215_v61 = vadd.f32 %v1214_v44, %v3743_v29  ;;  %v1424_v54 = vmul.f32 %v3219_v58, %v1408_v62  ;;  %v3195_v44 = vld [vmem:[#allocation13 + $0x18] sm:$0xff]   ;;  %v3200_v58 = vld [vmem:[#allocation13 + $0xd0] sm:$0xff]  }
 0x232   :  { %v1216_v63 = vpop.f32.mrf.mxu0  ;;  %v1453_v3 = vpack.c.bf16 %v1439_v57, %v1438_v52  ;;  %2836 = vmatpush3.bf16.msra.mxu0 %v3183_v35  ;;  %2900 = vmatpush3.bf16.msra.mxu1 %v3185_v37  ;;  %v1410_v37 = vld [vmem:[#allocation5 + $0x30] sm:$0xff] }
 0x233   :  { %v1329_v2 = vpop.f32.mrf.mxu1  ;;  %v1365_v8 = vmul.f32 0.5, %v1324_v60  ;;  %2590 = vst [vmem:[#allocation17 + $0x48] sm:$0xff] %v1324_v60  ;;  %v3805_v1 = vadd.f32 %v1327_v51, %v1215_v61  ;;  %v1217_v55 = vadd.f32 %v1216_v63, %v3746_v30  ;;  %2837 = vmatprep.subr.bf16.mxu0 %v3186_v41  ;;  %2901 = vmatprep.subr.bf16.mxu1 %v3188_v42  ;;  %3226 = vpow2.f32 %v1388_v59  ;;  %v1411_v42 = vld [vmem:[#allocation5 + $0x38] sm:$0xff] }
 0x234   :  { %v3221_v11 = vpop.eup %3220  ;;  %1717 = vmatmul.mubr.bf16.gmra.mxu0 %v1453_v3  ;;  %1830 = vmatmul.mubr.bf16.gmra.mxu1 %v1453_v3  ;;  %v1218_v56 = vpop.f32.mrf.mxu0  ;;  %v1440_v28 = vadd.f32 %v1424_v54, %v3769_v17  ;;  %v3197_v51 = vld [vmem:[#allocation13 + $0x98] sm:$0xff]   ;;  %v3198_v57 = vld [vmem:[#allocation13 + $0x50] sm:$0xff]  }
 0x235   :  { %v1331_v53 = vpop.f32.mrf.mxu1  ;;  %v1390_v12 = vmul.f32 1.442695, %v1365_v8  ;;  %2575 = vst [vmem:[#allocation15 + $0x50] sm:$0xff] %v3805_v1  ;;  %v1330_v13 = vadd.f32 %v1329_v2, %v1217_v55  ;;  %v1219_v14 = vadd.f32 %v1218_v56, %v3743_v29  ;;  %1726 = vmatprep.mubr.bf16.mxu0 %v3531_v0  ;;  %1839 = vmatprep.mubr.bf16.mxu1 %v3531_v0  ;;  %v3199_v8 = vld [vmem:[#allocation13 + $0x10] sm:$0xff]   ;;  %v3202_v56 = vld [vmem:[#allocation13 + $0x48] sm:$0xff]  }
 0x236   :  { %v1425_v15 = vmul.f32 %v3221_v11, %v1409_v5  ;;  %v1220_v16 = vpop.f32.mrf.mxu0  ;;  %2838 = vmatpush3.bf16.msra.mxu0 %v3187_v6  ;;  %2902 = vmatpush3.bf16.msra.mxu1 %v3189_v7  ;;  %v3201_v55 = vld [vmem:[#allocation13 + $0x90] sm:$0xff]  }
 0x237   :  { %v1333_v18 = vpop.f32.mrf.mxu1  ;;  %3228 = vpow2.f32 %v1390_v12  ;;  %v1366_v50 = vmul.f32 0.5, %v1330_v13  ;;  %2591 = vst [vmem:[#allocation17 + $0x50] sm:$0xff] %v1330_v13  ;;  %v3812_v21 = vadd.f32 %v1331_v53, %v1219_v14  ;;  %v1221_v22 = vadd.f32 %v1220_v16, %v3746_v30  ;;  %2839 = vmatprep.subr.bf16.mxu0 %v3190_v9  ;;  %2903 = vmatprep.subr.bf16.mxu1 %v3192_v10  ;;  %v3204_v53 = vld [vmem:[#allocation13 + $0xc8] sm:$0xff]  }
 0x238   :  { %v1224_v25 = vpop.f32.mrf.mxu0  ;;  %v1441_v31 = vadd.f32 %v1425_v15, %v3774_v27  ;;  %v3223_v32 = vpop.eup %3222 }
 0x239   :  { %v1337_v26 = vpop.f32.mrf.mxu1  ;;  %v1392_v33 = vmul.f32 1.442695, %v1366_v50  ;;  %2576 = vst [vmem:[#allocation15 + $0x58] sm:$0xff] %v3812_v21  ;;  %v1334_v34 = vadd.f32 %v1333_v18, %v1221_v22  ;;  %v1225_v35 = vadd.f32 %v1224_v25, %v3743_v29  ;;  %v1426_v62 = vmul.f32 %v3223_v32, %v1410_v37  ;;  %v3203_v25 = vld [vmem:[#allocation13 + $0x8] sm:$0xff]  }
 0x23a   :  { %v1226_v38 = vpop.f32.mrf.mxu0  ;;  %v1454_v41 = vpack.c.bf16 %v1441_v31, %v1440_v28  ;;  %2840 = vmatpush3.bf16.msra.mxu0 %v3191_v19  ;;  %2904 = vmatpush3.bf16.msra.mxu1 %v3193_v36  ;;  %v1412_v36 = vld [vmem:[#allocation5 + $0x40] sm:$0xff] }
 0x23b   :  { %v1339_v40 = vpop.f32.mrf.mxu1  ;;  %3230 = vpow2.f32 %v1392_v33  ;;  %v1367_v17 = vmul.f32 0.5, %v1334_v34  ;;  %2592 = vst [vmem:[#allocation17 + $0x58] sm:$0xff] %v1334_v34  ;;  %v3819_v27 = vadd.f32 %v1337_v26, %v1225_v35  ;;  %v1227_v52 = vadd.f32 %v1226_v38, %v3746_v30  ;;  %2841 = vmatprep.subr.bf16.mxu0 %v3194_v23  ;;  %2905 = vmatprep.subr.bf16.mxu1 %v3196_v24  ;;  %v1413_v24 = vld [vmem:[#allocation5 + $0x48] sm:$0xff] }
 0x23c   :  { %v3225_v59 = vpop.eup %3224  ;;  %1727 = vmatmul.mubr.bf16.gmra.mxu0 %v1454_v41  ;;  %1840 = vmatmul.mubr.bf16.gmra.mxu1 %v1454_v41  ;;  %v1228_v60 = vpop.f32.mrf.mxu0  ;;  %v1442_v13 = vadd.f32 %v1426_v62, %v3779_v43 }
 0x23d   :  { %v1341_v61 = vpop.f32.mrf.mxu1  ;;  %v1394_v63 = vmul.f32 1.442695, %v1367_v17  ;;  %2577 = vst [vmem:[#allocation15 + $0x60] sm:$0xff] %v3819_v27  ;;  %v1340_v2 = vadd.f32 %v1339_v40, %v1227_v52  ;;  %v1229_v3 = vadd.f32 %v1228_v60, %v3743_v29  ;;  %1736 = vmatprep.mubr.bf16.mxu0 %v3531_v0  ;;  %1849 = vmatprep.mubr.bf16.mxu1 %v3531_v0 }
 0x23e   :  { %v1427_v5 = vmul.f32 %v3225_v59, %v1411_v42  ;;  %v1230_v6 = vpop.f32.mrf.mxu0  ;;  %2842 = vmatpush3.bf16.msra.mxu0 %v3195_v44  ;;  %2906 = vmatpush3.bf16.msra.mxu1 %v3197_v51 }
 0x23f   :  { %v1343_v7 = vpop.f32.mrf.mxu1  ;;  %3232 = vpow2.f32 %v1394_v63  ;;  %v1368_v9 = vmul.f32 0.5, %v1340_v2  ;;  %2593 = vst [vmem:[#allocation17 + $0x60] sm:$0xff] %v1340_v2  ;;  %v3826_v10 = vadd.f32 %v1341_v61, %v1229_v3  ;;  %v1231_v11 = vadd.f32 %v1230_v6, %v3746_v30  ;;  %2843 = vmatprep.subr.bf16.mxu0 %v3198_v57  ;;  %2907 = vmatprep.subr.bf16.mxu1 %v3200_v58  ;;  %v1415_v61 = vld [vmem:[#allocation5 + $0x58] sm:$0xff]  ;;  %v1416_v6 = vld [vmem:[#allocation5 + $0x60] sm:$0xff] }
 0x240   :  { %v1234_v54 = vpop.f32.mrf.mxu0  ;;  %v1443_v14 = vadd.f32 %v1427_v5, %v3784_v4  ;;  %v3227_v15 = vpop.eup %3226 }
 0x241   :  { %v1347_v12 = vpop.f32.mrf.mxu1  ;;  %v1396_v16 = vmul.f32 1.442695, %v1368_v9  ;;  %2578 = vst [vmem:[#allocation15 + $0x68] sm:$0xff] %v3826_v10  ;;  %v1344_v18 = vadd.f32 %v1343_v7, %v1231_v11  ;;  %v1235_v19 = vadd.f32 %v1234_v54, %v3743_v29  ;;  %v1428_v33 = vmul.f32 %v3227_v15, %v1412_v36  ;;  %v1418_v54 = vld [vmem:[#allocation5 + $0x70] sm:$0xff]  ;;  %v3208_v36 = vld [vmem:[#allocation13 + $0xc0] sm:$0xff]  }
 0x242   :  { %v1236_v50 = vpop.f32.mrf.mxu0  ;;  %v1455_v23 = vpack.c.bf16 %v1443_v14, %v1442_v13  ;;  %2844 = vmatpush3.bf16.msra.mxu0 %v3199_v8  ;;  %2908 = vmatpush3.bf16.msra.mxu1 %v3201_v55  ;;  %v1417_v8 = vld [vmem:[#allocation5 + $0x68] sm:$0xff] }
 0x243   :  { %v1349_v22 = vpop.f32.mrf.mxu1  ;;  %3234 = vpow2.f32 %v1396_v16  ;;  %v1369_v26 = vmul.f32 0.5, %v1344_v18  ;;  %2594 = vst [vmem:[#allocation17 + $0x68] sm:$0xff] %v1344_v18  ;;  %v3833_v43 = vadd.f32 %v1347_v12, %v1235_v19  ;;  %v1237_v4 = vadd.f32 %v1236_v50, %v3746_v30  ;;  %2845 = vmatprep.subr.bf16.mxu0 %v3202_v56  ;;  %2909 = vmatprep.subr.bf16.mxu1 %v3204_v53  ;;  %v1419_v12 = vld [vmem:[#allocation5 + $0x78] sm:$0xff]  ;;  %v3207_v50 = vld [vmem:[#allocation13] sm:$0xff]  }
 0x244   :  { %v3229_v28 = vpop.eup %3228  ;;  %1737 = vmatmul.mubr.bf16.gmra.mxu0 %v1455_v23  ;;  %1850 = vmatmul.mubr.bf16.gmra.mxu1 %v1455_v23  ;;  %v1238_v31 = vpop.f32.mrf.mxu0  ;;  %v1444_v52 = vadd.f32 %v1428_v33, %v3791_v20 }
 0x245   :  { %v1351_v32 = vpop.f32.mrf.mxu1  ;;  %v1398_v34 = vmul.f32 1.442695, %v1369_v26  ;;  %2579 = vst [vmem:[#allocation15 + $0x70] sm:$0xff] %v3833_v43  ;;  %v1350_v35 = vadd.f32 %v1349_v22, %v1237_v4  ;;  %v1239_v37 = vadd.f32 %v1238_v31, %v3743_v29  ;;  %1746 = vmatprep.mubr.bf16.mxu0 %v3531_v0  ;;  %1859 = vmatprep.mubr.bf16.mxu1 %v3531_v0  ;;  %v1414_v29 = vld [vmem:[#allocation5 + $0x50] sm:$0xff]  ;;  %v3209_v22 = vld [vmem:[#allocation13 + $0x80] sm:$0xff]  }
 0x246   :  { %v1429_v38 = vmul.f32 %v3229_v28, %v1413_v24  ;;  %v1240_v40 = vpop.f32.mrf.mxu0  ;;  %2846 = vmatpush3.bf16.msra.mxu0 %v3203_v25 }
 0x247   :  { %3236 = vpow2.f32 %v1398_v34  ;;  %v1370_v41 = vmul.f32 0.5, %v1350_v35  ;;  %2595 = vst [vmem:[#allocation17 + $0x70] sm:$0xff] %v1350_v35  ;;  %v1352_v42 = vadd.f32 %v1351_v32, %v1239_v37  ;;  %v1241_v44 = vadd.f32 %v1240_v40, %v3746_v30  ;;  %v1353_v17 = vpop.f32.mrf.mxu1 }
 0x248   :  { %v3231_v51 = vpop.eup %3230  ;;  %v1445_v57 = vadd.f32 %v1429_v38, %v3798_v39 }
 0x249   :  { %v1400_v58 = vmul.f32 1.442695, %v1370_v41  ;;  %2580 = vst [vmem:[#allocation15 + $0x78] sm:$0xff] %v1352_v42  ;;  %v1354_v59 = vadd.f32 %v1353_v17, %v1241_v44  ;;  %v1430_v63 = vmul.f32 %v3231_v51, %v1414_v29 }
 0x24a   :  { %v1456_v60 = vpack.c.bf16 %v1445_v57, %v1444_v52 }
 0x24b   :  { %3238 = vpow2.f32 %v1400_v58  ;;  %v1371_v62 = vmul.f32 0.5, %v1354_v59  ;;  %2596 = vst [vmem:[#allocation17 + $0x78] sm:$0xff] %v1354_v59  ;;  %v1446_v39 = vadd.f32 %v1430_v63, %v3805_v1 }
 0x24c   :  { %v3233_v2 = vpop.eup %3232  ;;  %1747 = vmatmul.mubr.bf16.gmra.mxu0 %v1456_v60  ;;  %1860 = vmatmul.mubr.bf16.gmra.mxu1 %v1456_v60 }
 0x24d   :  { %v1402_v30 = vmul.f32 1.442695, %v1371_v62  ;;  %1756 = vmatprep.mubr.bf16.mxu0 %v3531_v0  ;;  %1869 = vmatprep.mubr.bf16.mxu1 %v3531_v0  ;;  %v1431_v20 = vmul.f32 %v3233_v2, %v1415_v61 }
 0x24f   :  { %3240 = vpow2.f32 %v1402_v30  ;;  %v1447_v3 = vadd.f32 %v1431_v20, %v3812_v21 }
 0x250   :  { %v3235_v5 = vpop.eup %3234 }
 0x251   :  { %v1457_v7 = vpack.c.bf16 %v1447_v3, %v1446_v39  ;;  %v1432_v55 = vmul.f32 %v3235_v5, %v1416_v6 }
 0x253   :  { %v1448_v56 = vadd.f32 %v1432_v55, %v3819_v27  ;;  %v3205_v27 = vld [vmem:[#allocation13 + $0x88] sm:$0xff]  }
 0x254   :  { %v3237_v9 = vpop.eup %3236  ;;  %1757 = vmatmul.mubr.bf16.gmra.mxu0 %v1457_v7  ;;  %1870 = vmatmul.mubr.bf16.gmra.mxu1 %v1457_v7 }
 0x255   :  { %1766 = vmatprep.mubr.bf16.mxu0 %v3531_v0  ;;  %1879 = vmatprep.mubr.bf16.mxu1 %v3531_v0  ;;  %v1433_v11 = vmul.f32 %v3237_v9, %v1417_v8 }
 0x256   :  { %2910 = vmatpush3.bf16.msra.mxu1 %v3205_v27 }
 0x257   :  { %v1449_v53 = vadd.f32 %v1433_v11, %v3826_v10  ;;  %v3206_v10 = vld [vmem:[#allocation13 + $0x40] sm:$0xff]   ;;  %2911 = vmatprep.subr.bf16.mxu1 %v3208_v36 }
 0x258   :  { %v3239_v1 = vpop.eup %3238  ;;  %2847 = vmatprep.subr.bf16.mxu0 %v3206_v10 }
 0x259   :  { %v1458_v21 = vpack.c.bf16 %v1449_v53, %v1448_v56  ;;  %v1434_v13 = vmul.f32 %v3239_v1, %v1418_v54  ;;  %2848 = vmatpush3.bf16.msra.mxu0 %v3207_v50 }
 0x25a   :  { %2912 = vmatpush3.bf16.msra.mxu1 %v3209_v22 }
 0x25b   :  { %v1450_v16 = vadd.f32 %v1434_v13, %v3833_v43 }
 0x25c   :  { %v3241_v14 = vpop.eup %3240  ;;  %1767 = vmatmul.mubr.bf16.gmra.mxu0 %v1458_v21  ;;  %1880 = vmatmul.mubr.bf16.gmra.mxu1 %v1458_v21 }
 0x25d   :  { %1776 = vmatprep.mubr.bf16.mxu0 %v3531_v0  ;;  %1889 = vmatprep.mubr.bf16.mxu1 %v3531_v0  ;;  %v1435_v15 = vmul.f32 %v3241_v14, %v1419_v12  ;;  %v1492_v0 = vld [vmem:[%s3981_s7] sm:$0xf]  ;;  %s3532_s7 = smov [#allocation15]  }
 0x25e   :  { %v3858_v25 = vrot.slane %v1492_v0, %v3652_v46  ;;  %v3862_v26 = vrot.slane %v1492_v0, %v198_v47  ;;  %v3865_v43 = vrot.slane %v1492_v0, %v3656_v48  ;;  %v3869_v4 = vrot.slane %v1492_v0, %v194_v49  ;;  %s2614_s4 = sshll.u32 %s3532_s7, 4  ;;  %s2615_s4 = int_to_ptr.vmem [resolvable:$true] %s2614_s4 }
 0x25f   :  { %v1451_v18 = vadd.f32 %v1435_v15, %v1352_v42  ;;  %s3446_s23 = scalar_lea.vmem %s2615_s4, 2048  ;;  %p3451_p8 = scmp.lt.s32.totalorder %s2615_s4, %s2615_s4 }
 0x260   :  { %p3447_p7 = scmp.ne.s32.totalorder %s2615_s4, %s3446_s23  ;;  %p3452_p9 = scmp.lt.s32.totalorder %s3446_s23, %s3446_s23 }
 0x261   :  { %v1459_v19 = vpack.c.bf16 %v1451_v18, %v1450_v16 }
 0x262   :  { %p3453_p10 = por %p3452_p9, %p3451_p8 }
 0x264   :  { %1777 = vmatmul.mubr.bf16.gmra.mxu0 %v1459_v19  ;;  %1890 = vmatmul.mubr.bf16.gmra.mxu1 %v1459_v19  ;;  %p3454_p11 = pnand %p3453_p10, %p3447_p7 }
 0x2ec   :  { %v1708_v23 = vpop.f32.mrf.mxu0  ;;  %v1821_v24 = vpop.f32.mrf.mxu1 }
 0x2ed   :  { %v1709_v37 = vadd.f32 %v1708_v23, %v3865_v43  ;;  %v1822_v48 = vadd.f32 %v1821_v24, %v3869_v4 }
 0x2ee   :  { %v1710_v28 = vpop.f32.mrf.mxu0  ;;  %v1823_v31 = vpop.f32.mrf.mxu1 }
 0x2ef   :  { %v1711_v34 = vadd.f32 %v1710_v28, %v3858_v25  ;;  %v1824_v46 = vadd.f32 %v1823_v31, %v3862_v26  ;;  %v1900_v58 = vmax.f32 %v1709_v37, 0.0  ;;  %v1902_v59 = vmax.f32 %v1822_v48, 0.0 }
 0x2f0   :  { %v1712_v32 = vpop.f32.mrf.mxu0  ;;  %v1825_v33 = vpop.f32.mrf.mxu1 }
 0x2f1   :  { %v1713_v35 = vadd.f32 %v1712_v32, %v3865_v43  ;;  %v1826_v47 = vadd.f32 %v1825_v33, %v3869_v4  ;;  %v1901_v17 = vmax.f32 %v1711_v34, 0.0  ;;  %v1903_v52 = vmax.f32 %v1824_v46, 0.0 }
 0x2f2   :  { %v1714_v38 = vpop.f32.mrf.mxu0  ;;  %v1827_v45 = vpop.f32.mrf.mxu1 }
 0x2f3   :  { %v1715_v49 = vadd.f32 %v1714_v38, %v3858_v25  ;;  %v1828_v40 = vadd.f32 %v1827_v45, %v3862_v26  ;;  %v1904_v41 = vmax.f32 %v1713_v35, 0.0  ;;  %v1906_v42 = vmax.f32 %v1826_v47, 0.0 }
 0x2f4   :  { %v1718_v44 = vpop.f32.mrf.mxu0  ;;  %v1831_v51 = vpop.f32.mrf.mxu1 }
 0x2f5   :  { %v1905_v57 = vmax.f32 %v1715_v49, 0.0  ;;  %v1907_v29 = vmax.f32 %v1828_v40, 0.0  ;;  %v1964_v2 = vpack.c.bf16 %v1904_v41, %v1900_v58  ;;  %v1966_v30 = vpack.c.bf16 %v1906_v42, %v1902_v59 }
 0x2f6   :  { %v1720_v60 = vpop.f32.mrf.mxu0  ;;  %v1833_v61 = vpop.f32.mrf.mxu1  ;;  %v1719_v8 = vadd.f32 %v1718_v44, %v3865_v43  ;;  %v1832_v55 = vadd.f32 %v1831_v51, %v3869_v4 }
 0x2f7   :  { %v1965_v62 = vpack.c.bf16 %v1905_v57, %v1901_v17  ;;  %v1967_v63 = vpack.c.bf16 %v1907_v29, %v1903_v52  ;;  %v1721_v20 = vadd.f32 %v1720_v60, %v3858_v25  ;;  %v1834_v5 = vadd.f32 %v1833_v61, %v3862_v26 }
 0x2f8   :  { %v1722_v39 = vpop.f32.mrf.mxu0  ;;  %v1835_v3 = vpop.f32.mrf.mxu1  ;;  %v1908_v18 = vmax.f32 %v1719_v8, 0.0  ;;  %v1910_v19 = vmax.f32 %v1832_v55, 0.0 }
 0x2f9   :  { %v1723_v6 = vadd.f32 %v1722_v39, %v3865_v43  ;;  %v1836_v7 = vadd.f32 %v1835_v3, %v3869_v4  ;;  %2291 = vmatprep.mubr.bf16.mxu0 %v1965_v62  ;;  %2388 = vmatprep.mubr.bf16.mxu1 %v1967_v63  ;;  %v1909_v13 = vmax.f32 %v1721_v20, 0.0  ;;  %v1911_v14 = vmax.f32 %v1834_v5, 0.0 }
 0x2fa   :  { %v1724_v9 = vpop.f32.mrf.mxu0  ;;  %v1837_v11 = vpop.f32.mrf.mxu1  ;;  %2292 = vmatmul.mubr.bf16.vlgmr.msra.gmra.mxu0 %v1964_v2  ;;  %2389 = vmatmul.mubr.bf16.vlgmr.msra.gmra.mxu1 %v1966_v30 }
 0x2fb   :  { %v1725_v56 = vadd.f32 %v1724_v9, %v3858_v25  ;;  %v1838_v53 = vadd.f32 %v1837_v11, %v3862_v26  ;;  %v1912_v1 = vmax.f32 %v1723_v6, 0.0  ;;  %v1914_v54 = vmax.f32 %v1836_v7, 0.0 }
 0x2fc   :  { %v1728_v21 = vpop.f32.mrf.mxu0  ;;  %v1841_v12 = vpop.f32.mrf.mxu1 }
 0x2fd   :  { %v1913_v15 = vmax.f32 %v1725_v56, 0.0  ;;  %v1915_v16 = vmax.f32 %v1838_v53, 0.0  ;;  %v1968_v22 = vpack.c.bf16 %v1912_v1, %v1908_v18  ;;  %v1970_v0 = vpack.c.bf16 %v1914_v54, %v1910_v19 }
 0x2fe   :  { %v1730_v27 = vpop.f32.mrf.mxu0  ;;  %v1843_v10 = vpop.f32.mrf.mxu1  ;;  %v1729_v34 = vadd.f32 %v1728_v21, %v3865_v43  ;;  %v1842_v46 = vadd.f32 %v1841_v12, %v3869_v4 }
 0x2ff   :  { %v1969_v36 = vpack.c.bf16 %v1913_v15, %v1909_v13  ;;  %v1971_v50 = vpack.c.bf16 %v1915_v16, %v1911_v14  ;;  %v1731_v23 = vadd.f32 %v1730_v27, %v3858_v25  ;;  %v1844_v31 = vadd.f32 %v1843_v10, %v3862_v26 }
 0x300   :  { %v1732_v24 = vpop.f32.mrf.mxu0  ;;  %v1845_v28 = vpop.f32.mrf.mxu1  ;;  %v1916_v17 = vmax.f32 %v1729_v34, 0.0  ;;  %v1918_v52 = vmax.f32 %v1842_v46, 0.0 }
 0x301   :  { %v1733_v32 = vadd.f32 %v1732_v24, %v3865_v43  ;;  %v1846_v33 = vadd.f32 %v1845_v28, %v3869_v4  ;;  %2299 = vmatprep.mubr.bf16.mxu0 %v1969_v36  ;;  %2396 = vmatprep.mubr.bf16.mxu1 %v1971_v50  ;;  %v1917_v41 = vmax.f32 %v1731_v23, 0.0  ;;  %v1919_v42 = vmax.f32 %v1844_v31, 0.0 }
 0x302   :  { %v1734_v35 = vpop.f32.mrf.mxu0  ;;  %v1847_v47 = vpop.f32.mrf.mxu1  ;;  %2300 = vmatmul.mubr.bf16.gmra.mxu0 %v1968_v22  ;;  %2397 = vmatmul.mubr.bf16.gmra.mxu1 %v1970_v0 }
 0x303   :  { %v1735_v37 = vadd.f32 %v1734_v35, %v3858_v25  ;;  %v1848_v48 = vadd.f32 %v1847_v47, %v3862_v26  ;;  %v1920_v38 = vmax.f32 %v1733_v32, 0.0  ;;  %v1922_v45 = vmax.f32 %v1846_v33, 0.0 }
 0x304   :  { %v1738_v49 = vpop.f32.mrf.mxu0  ;;  %v1851_v40 = vpop.f32.mrf.mxu1 }
 0x305   :  { %v1921_v44 = vmax.f32 %v1735_v37, 0.0  ;;  %v1923_v51 = vmax.f32 %v1848_v48, 0.0  ;;  %v1972_v60 = vpack.c.bf16 %v1920_v38, %v1916_v17  ;;  %v1974_v61 = vpack.c.bf16 %v1922_v45, %v1918_v52 }
 0x306   :  { %v1740_v57 = vpop.f32.mrf.mxu0  ;;  %v1853_v29 = vpop.f32.mrf.mxu1  ;;  %v1739_v3 = vadd.f32 %v1738_v49, %v3865_v43  ;;  %v1852_v5 = vadd.f32 %v1851_v40, %v3869_v4 }
 0x307   :  { %v1973_v58 = vpack.c.bf16 %v1921_v44, %v1917_v41  ;;  %v1975_v59 = vpack.c.bf16 %v1923_v51, %v1919_v42  ;;  %v1741_v62 = vadd.f32 %v1740_v57, %v3858_v25  ;;  %v1854_v30 = vadd.f32 %v1853_v29, %v3862_v26 }
 0x308   :  { %v1742_v63 = vpop.f32.mrf.mxu0  ;;  %v1855_v2 = vpop.f32.mrf.mxu1  ;;  %v1924_v13 = vmax.f32 %v1739_v3, 0.0  ;;  %v1926_v14 = vmax.f32 %v1852_v5, 0.0 }
 0x309   :  { %v1743_v20 = vadd.f32 %v1742_v63, %v3865_v43  ;;  %v1856_v39 = vadd.f32 %v1855_v2, %v3869_v4  ;;  %2307 = vmatprep.mubr.bf16.mxu0 %v1973_v58  ;;  %2404 = vmatprep.mubr.bf16.mxu1 %v1975_v59  ;;  %v1925_v1 = vmax.f32 %v1741_v62, 0.0  ;;  %v1927_v54 = vmax.f32 %v1854_v30, 0.0 }
 0x30a   :  { %v1744_v6 = vpop.f32.mrf.mxu0  ;;  %v1857_v7 = vpop.f32.mrf.mxu1  ;;  %2308 = vmatmul.mubr.bf16.gmra.mxu0 %v1972_v60  ;;  %2405 = vmatmul.mubr.bf16.gmra.mxu1 %v1974_v61 }
 0x30b   :  { %v1745_v8 = vadd.f32 %v1744_v6, %v3858_v25  ;;  %v1858_v55 = vadd.f32 %v1857_v7, %v3862_v26  ;;  %v1928_v9 = vmax.f32 %v1743_v20, 0.0  ;;  %v1930_v11 = vmax.f32 %v1856_v39, 0.0 }
 0x30c   :  { %v1748_v56 = vpop.f32.mrf.mxu0  ;;  %v1861_v53 = vpop.f32.mrf.mxu1 }
 0x30d   :  { %v1929_v21 = vmax.f32 %v1745_v8, 0.0  ;;  %v1931_v12 = vmax.f32 %v1858_v55, 0.0  ;;  %v1976_v27 = vpack.c.bf16 %v1928_v9, %v1924_v13  ;;  %v1978_v10 = vpack.c.bf16 %v1930_v11, %v1926_v14 }
 0x30e   :  { %v1750_v15 = vpop.f32.mrf.mxu0  ;;  %v1863_v16 = vpop.f32.mrf.mxu1  ;;  %v1749_v28 = vadd.f32 %v1748_v56, %v3865_v43  ;;  %v1862_v31 = vadd.f32 %v1861_v53, %v3869_v4 }
 0x30f   :  { %v1977_v18 = vpack.c.bf16 %v1929_v21, %v1925_v1  ;;  %v1979_v19 = vpack.c.bf16 %v1931_v12, %v1927_v54  ;;  %v1751_v36 = vadd.f32 %v1750_v15, %v3858_v25  ;;  %v1864_v0 = vadd.f32 %v1863_v16, %v3862_v26 }
 0x310   :  { %v1752_v50 = vpop.f32.mrf.mxu0  ;;  %v1865_v22 = vpop.f32.mrf.mxu1  ;;  %v1932_v41 = vmax.f32 %v1749_v28, 0.0  ;;  %v1934_v42 = vmax.f32 %v1862_v31, 0.0 }
 0x311   :  { %v1753_v23 = vadd.f32 %v1752_v50, %v3865_v43  ;;  %v1866_v24 = vadd.f32 %v1865_v22, %v3869_v4  ;;  %2315 = vmatprep.mubr.bf16.mxu0 %v1977_v18  ;;  %2412 = vmatprep.mubr.bf16.mxu1 %v1979_v19  ;;  %v1933_v38 = vmax.f32 %v1751_v36, 0.0  ;;  %v1935_v45 = vmax.f32 %v1864_v0, 0.0 }
 0x312   :  { %v1754_v32 = vpop.f32.mrf.mxu0  ;;  %v1867_v33 = vpop.f32.mrf.mxu1  ;;  %2316 = vmatmul.mubr.bf16.gmra.mxu0 %v1976_v27  ;;  %2413 = vmatmul.mubr.bf16.gmra.mxu1 %v1978_v10 }
 0x313   :  { %v1755_v34 = vadd.f32 %v1754_v32, %v3858_v25  ;;  %v1868_v46 = vadd.f32 %v1867_v33, %v3862_v26  ;;  %v1936_v35 = vmax.f32 %v1753_v23, 0.0  ;;  %v1938_v47 = vmax.f32 %v1866_v24, 0.0 }
 0x314   :  { %v1758_v37 = vpop.f32.mrf.mxu0  ;;  %v1871_v48 = vpop.f32.mrf.mxu1 }
 0x315   :  { %v1937_v49 = vmax.f32 %v1755_v34, 0.0  ;;  %v1939_v40 = vmax.f32 %v1868_v46, 0.0  ;;  %v1980_v57 = vpack.c.bf16 %v1936_v35, %v1932_v41  ;;  %v1982_v29 = vpack.c.bf16 %v1938_v47, %v1934_v42 }
 0x316   :  { %v1760_v44 = vpop.f32.mrf.mxu0  ;;  %v1873_v51 = vpop.f32.mrf.mxu1  ;;  %v1759_v2 = vadd.f32 %v1758_v37, %v3865_v43  ;;  %v1872_v30 = vadd.f32 %v1871_v48, %v3869_v4 }
 0x317   :  { %v1981_v17 = vpack.c.bf16 %v1937_v49, %v1933_v38  ;;  %v1983_v52 = vpack.c.bf16 %v1939_v40, %v1935_v45  ;;  %v1761_v58 = vadd.f32 %v1760_v44, %v3858_v25  ;;  %v1874_v61 = vadd.f32 %v1873_v51, %v3862_v26 }
 0x318   :  { %v1762_v59 = vpop.f32.mrf.mxu0  ;;  %v1875_v60 = vpop.f32.mrf.mxu1  ;;  %v1940_v1 = vmax.f32 %v1759_v2, 0.0  ;;  %v1942_v54 = vmax.f32 %v1872_v30, 0.0 }
 0x319   :  { %v1763_v62 = vadd.f32 %v1762_v59, %v3865_v43  ;;  %v1876_v63 = vadd.f32 %v1875_v60, %v3869_v4  ;;  %2323 = vmatprep.mubr.bf16.mxu0 %v1981_v17  ;;  %2420 = vmatprep.mubr.bf16.mxu1 %v1983_v52  ;;  %v1941_v9 = vmax.f32 %v1761_v58, 0.0  ;;  %v1943_v11 = vmax.f32 %v1874_v61, 0.0 }
 0x31a   :  { %v1764_v20 = vpop.f32.mrf.mxu0  ;;  %v1877_v39 = vpop.f32.mrf.mxu1  ;;  %2324 = vmatmul.mubr.bf16.gmra.mxu0 %v1980_v57  ;;  %2421 = vmatmul.mubr.bf16.gmra.mxu1 %v1982_v29 }
 0x31b   :  { %v1765_v3 = vadd.f32 %v1764_v20, %v3858_v25  ;;  %v1878_v5 = vadd.f32 %v1877_v39, %v3862_v26  ;;  %v1944_v6 = vmax.f32 %v1763_v62, 0.0  ;;  %v1946_v7 = vmax.f32 %v1876_v63, 0.0 }
 0x31c   :  { %v1768_v8 = vpop.f32.mrf.mxu0  ;;  %v1881_v55 = vpop.f32.mrf.mxu1 }
 0x31d   :  { %v1945_v56 = vmax.f32 %v1765_v3, 0.0  ;;  %v1947_v53 = vmax.f32 %v1878_v5, 0.0  ;;  %v1984_v15 = vpack.c.bf16 %v1944_v6, %v1940_v1  ;;  %v1986_v16 = vpack.c.bf16 %v1946_v7, %v1942_v54 }
 0x31e   :  { %v1770_v21 = vpop.f32.mrf.mxu0  ;;  %v1883_v12 = vpop.f32.mrf.mxu1  ;;  %v1769_v22 = vadd.f32 %v1768_v8, %v3865_v43  ;;  %v1882_v0 = vadd.f32 %v1881_v55, %v3869_v4 }
 0x31f   :  { %v1985_v13 = vpack.c.bf16 %v1945_v56, %v1941_v9  ;;  %v1987_v14 = vpack.c.bf16 %v1947_v53, %v1943_v11  ;;  %v1771_v18 = vadd.f32 %v1770_v21, %v3858_v25  ;;  %v1884_v10 = vadd.f32 %v1883_v12, %v3862_v26 }
 0x320   :  { %v1772_v19 = vpop.f32.mrf.mxu0  ;;  %v1885_v27 = vpop.f32.mrf.mxu1  ;;  %v1948_v38 = vmax.f32 %v1769_v22, 0.0  ;;  %v1950_v45 = vmax.f32 %v1882_v0, 0.0 }
 0x321   :  { %v1773_v36 = vadd.f32 %v1772_v19, %v3865_v43  ;;  %v1886_v50 = vadd.f32 %v1885_v27, %v3869_v4  ;;  %2331 = vmatprep.mubr.bf16.mxu0 %v1985_v13  ;;  %2428 = vmatprep.mubr.bf16.mxu1 %v1987_v14  ;;  %v1949_v35 = vmax.f32 %v1771_v18, 0.0  ;;  %v1951_v47 = vmax.f32 %v1884_v10, 0.0 }
 0x322   :  { %v1774_v23 = vpop.f32.mrf.mxu0  ;;  %v1887_v24 = vpop.f32.mrf.mxu1  ;;  %2332 = vmatmul.mubr.bf16.gmra.mxu0 %v1984_v15  ;;  %2429 = vmatmul.mubr.bf16.gmra.mxu1 %v1986_v16 }
 0x323   :  { %v1775_v28 = vadd.f32 %v1774_v23, %v3858_v25  ;;  %v1888_v31 = vadd.f32 %v1887_v24, %v3862_v26  ;;  %v1952_v32 = vmax.f32 %v1773_v36, 0.0  ;;  %v1954_v33 = vmax.f32 %v1886_v50, 0.0 }
 0x324   :  { %v1778_v34 = vpop.f32.mrf.mxu0  ;;  %v1891_v46 = vpop.f32.mrf.mxu1 }
 0x325   :  { %v1953_v37 = vmax.f32 %v1775_v28, 0.0  ;;  %v1955_v48 = vmax.f32 %v1888_v31, 0.0  ;;  %v1988_v44 = vpack.c.bf16 %v1952_v32, %v1948_v38  ;;  %v1990_v51 = vpack.c.bf16 %v1954_v33, %v1950_v45 }
 0x326   :  { %v1780_v49 = vpop.f32.mrf.mxu0  ;;  %v1893_v40 = vpop.f32.mrf.mxu1  ;;  %v1779_v60 = vadd.f32 %v1778_v34, %v3865_v43  ;;  %v1892_v61 = vadd.f32 %v1891_v46, %v3869_v4 }
 0x327   :  { %v1989_v41 = vpack.c.bf16 %v1953_v37, %v1949_v35  ;;  %v1991_v42 = vpack.c.bf16 %v1955_v48, %v1951_v47  ;;  %v1781_v17 = vadd.f32 %v1780_v49, %v3858_v25  ;;  %v1894_v29 = vadd.f32 %v1893_v40, %v3862_v26 }
 0x328   :  { %v1782_v52 = vpop.f32.mrf.mxu0  ;;  %v1895_v57 = vpop.f32.mrf.mxu1  ;;  %v1956_v8 = vmax.f32 %v1779_v60, 0.0  ;;  %v1958_v55 = vmax.f32 %v1892_v61, 0.0 }
 0x329   :  { %v1783_v58 = vadd.f32 %v1782_v52, %v3865_v43  ;;  %v1896_v59 = vadd.f32 %v1895_v57, %v3869_v4  ;;  %2339 = vmatprep.mubr.bf16.mxu0 %v1989_v41  ;;  %2436 = vmatprep.mubr.bf16.mxu1 %v1991_v42  ;;  %v1957_v3 = vmax.f32 %v1781_v17, 0.0  ;;  %v1959_v5 = vmax.f32 %v1894_v29, 0.0 }
 0x32a   :  { %v1784_v62 = vpop.f32.mrf.mxu0  ;;  %v1897_v63 = vpop.f32.mrf.mxu1  ;;  %2340 = vmatmul.mubr.bf16.gmra.mxu0 %v1988_v44  ;;  %2437 = vmatmul.mubr.bf16.gmra.mxu1 %v1990_v51 }
 0x32b   :  { %v1785_v2 = vadd.f32 %v1784_v62, %v3858_v25  ;;  %v1898_v30 = vadd.f32 %v1897_v63, %v3862_v26  ;;  %v1960_v20 = vmax.f32 %v1783_v58, 0.0  ;;  %v1962_v39 = vmax.f32 %v1896_v59, 0.0 }
 0x32d   :  { %v1961_v6 = vmax.f32 %v1785_v2, 0.0  ;;  %v1963_v7 = vmax.f32 %v1898_v30, 0.0  ;;  %v1992_v11 = vpack.c.bf16 %v1960_v20, %v1956_v8  ;;  %v1994_v4 = vpack.c.bf16 %v1962_v39, %v1958_v55 }
 0x32f   :  { %v1993_v9 = vpack.c.bf16 %v1961_v6, %v1957_v3  ;;  %v1995_v43 = vpack.c.bf16 %v1963_v7, %v1959_v5 }
 0x331   :  { %2347 = vmatprep.mubr.bf16.mxu0 %v1993_v9  ;;  %2444 = vmatprep.mubr.bf16.mxu1 %v1995_v43 }
 0x332   :  { %2348 = vmatmul.mubr.bf16.gmra.mxu0 %v1992_v11  ;;  %2445 = vmatmul.mubr.bf16.gmra.mxu1 %v1994_v4 }
 0x333   :  { %3457 = shalt.err (!%p3454_p11)
}
 0x334   :  { %2620 = dma.vmem_to_hbm [thread:$0]  %s2615_s4, 2048, %s3985_s11, [#allocation16], %s3519_s24, %s3519_s24, %s3520_s25  }
 0x335   :  { %s3533_s28 = smov [#allocation17]  }
 0x336   :  { %s2626_s29 = sshll.u32 %s3533_s28, 4  ;;  %s2627_s29 = int_to_ptr.vmem [resolvable:$true] %s2626_s29 }
 0x337   :  { %s3466_s30 = scalar_lea.vmem %s2627_s29, 2048  ;;  %p3471_p13 = scmp.lt.s32.totalorder %s2627_s29, %s2627_s29 }
 0x338   :  { %p3467_p12 = scmp.ne.s32.totalorder %s2627_s29, %s3466_s30  ;;  %p3472_p0 = scmp.lt.s32.totalorder %s3466_s30, %s3466_s30 }
 0x33a   :  { %p3473_p1 = por %p3472_p0, %p3471_p13 }
 0x33c   :  { %p3474_p2 = pnand %p3473_p1, %p3467_p12 }
 0x33e   :  { %3477 = shalt.err (!%p3474_p2)
}
 0x33f   :  { %2632 = dma.vmem_to_hbm [thread:$0]  %s2627_s29, 2048, %s3986_s12, [#allocation16], %s3519_s24, %s3519_s24, %s3520_s25  }
 0x340   :  { %v3950_v56 = vld [vmem:[%s3983_s9] ss:$0 sm:$0xff]  ;;  %s3534_s9 = smov [#allocation14]  }
 0x341   :  { %s2602_s12 = sshll.u32 %s3534_s9, 4  ;;  %s2603_s12 = int_to_ptr.vmem [resolvable:$true] %s2602_s12 }
 0x342   :  { %s3486_s15 = scalar_lea.vmem %s2603_s12, 2048  ;;  %p3491_p4 = scmp.lt.s32.totalorder %s2603_s12, %s2603_s12 }
 0x343   :  { %p3487_p3 = scmp.ne.s32.totalorder %s2603_s12, %s3486_s15  ;;  %p3492_p5 = scmp.lt.s32.totalorder %s3486_s15, %s3486_s15 }
 0x345   :  { %p3493_p6 = por %p3492_p5, %p3491_p4 }
 0x347   :  { %p3494_p7 = pnand %p3493_p6, %p3487_p3 }
 0x3ba   :  { %v2849_v25 = vpop.f32.mrf.mxu0  ;;  %v2913_v26 = vpop.f32.mrf.mxu1 }
 0x3bc   :  { %v2850_v53 = vpop.f32.mrf.mxu0  ;;  %v2914_v1 = vpop.f32.mrf.mxu1 }
 0x3bd   :  { %v2851_v54 = vadd.f32 %v2850_v53, %v2849_v25  ;;  %v2915_v14 = vadd.f32 %v2914_v1, %v2913_v26 }
 0x3be   :  { %v2852_v21 = vpop.f32.mrf.mxu0  ;;  %v2916_v12 = vpop.f32.mrf.mxu1 }
 0x3bf   :  { %v2294_v13 = vadd.f32 %v2851_v54, %v3950_v56 }
 0x3c0   :  { %v2853_v15 = vpop.f32.mrf.mxu0  ;;  %v2917_v16 = vpop.f32.mrf.mxu1 }
 0x3c1   :  { %v2391_v18 = vadd.f32 %v2915_v14, %v2294_v13  ;;  %v2854_v19 = vadd.f32 %v2853_v15, %v2852_v21  ;;  %v2918_v22 = vadd.f32 %v2917_v16, %v2916_v12 }
 0x3c2   :  { %v2855_v27 = vpop.f32.mrf.mxu0  ;;  %v2919_v10 = vpop.f32.mrf.mxu1 }
 0x3c3   :  { %v2817_v36 = vmul.f32 -1.442695, %v2391_v18  ;;  %v2297_v50 = vadd.f32 %v2854_v19, %v3950_v56 }
 0x3c4   :  { %v2856_v0 = vpop.f32.mrf.mxu0  ;;  %v2920_v23 = vpop.f32.mrf.mxu1 }
 0x3c5   :  { %3242 = vpow2.f32 %v2817_v36  ;;  %v2394_v24 = vadd.f32 %v2918_v22, %v2297_v50  ;;  %v2857_v28 = vadd.f32 %v2856_v0, %v2855_v27  ;;  %v2921_v46 = vadd.f32 %v2920_v23, %v2919_v10 }
 0x3c6   :  { %v2858_v31 = vpop.f32.mrf.mxu0  ;;  %v2922_v32 = vpop.f32.mrf.mxu1 }
 0x3c7   :  { %v2818_v33 = vmul.f32 -1.442695, %v2394_v24  ;;  %v2302_v34 = vadd.f32 %v2857_v28, %v3950_v56 }
 0x3c8   :  { %v2859_v35 = vpop.f32.mrf.mxu0  ;;  %v2923_v47 = vpop.f32.mrf.mxu1 }
 0x3c9   :  { %3244 = vpow2.f32 %v2818_v33  ;;  %v2399_v37 = vadd.f32 %v2921_v46, %v2302_v34  ;;  %v2860_v48 = vadd.f32 %v2859_v35, %v2858_v31  ;;  %v2924_v41 = vadd.f32 %v2923_v47, %v2922_v32 }
 0x3ca   :  { %v2861_v38 = vpop.f32.mrf.mxu0  ;;  %v2925_v45 = vpop.f32.mrf.mxu1 }
 0x3cb   :  { %v2819_v49 = vmul.f32 -1.442695, %v2399_v37  ;;  %v2305_v40 = vadd.f32 %v2860_v48, %v3950_v56 }
 0x3cc   :  { %v2862_v42 = vpop.f32.mrf.mxu0  ;;  %v2926_v44 = vpop.f32.mrf.mxu1 }
 0x3cd   :  { %3246 = vpow2.f32 %v2819_v49  ;;  %v2402_v51 = vadd.f32 %v2924_v41, %v2305_v40  ;;  %v2863_v17 = vadd.f32 %v2862_v42, %v2861_v38  ;;  %v2927_v59 = vadd.f32 %v2926_v44, %v2925_v45 }
 0x3ce   :  { %v2864_v52 = vpop.f32.mrf.mxu0  ;;  %v2928_v57 = vpop.f32.mrf.mxu1 }
 0x3cf   :  { %v2820_v29 = vmul.f32 -1.442695, %v2402_v51  ;;  %v2310_v58 = vadd.f32 %v2863_v17, %v3950_v56 }
 0x3d0   :  { %v2865_v60 = vpop.f32.mrf.mxu0  ;;  %v2929_v61 = vpop.f32.mrf.mxu1 }
 0x3d1   :  { %3248 = vpow2.f32 %v2820_v29  ;;  %v2407_v62 = vadd.f32 %v2927_v59, %v2310_v58  ;;  %v2866_v63 = vadd.f32 %v2865_v60, %v2864_v52  ;;  %v2930_v6 = vadd.f32 %v2929_v61, %v2928_v57 }
 0x3d2   :  { %v3243_v2 = vpop.eup %3242  ;;  %v2867_v30 = vpop.f32.mrf.mxu0 }
 0x3d3   :  { %v2931_v20 = vpop.f32.mrf.mxu1  ;;  %v2501_v39 = vadd.f32 1.0, %v3243_v2  ;;  %v2821_v3 = vmul.f32 -1.442695, %v2407_v62  ;;  %v2313_v5 = vadd.f32 %v2866_v63, %v3950_v56 }
 0x3d4   :  { %v2868_v7 = vpop.f32.mrf.mxu0 }
 0x3d5   :  { %v2932_v8 = vpop.f32.mrf.mxu1  ;;  %3250 = vrcp.f32 %v2501_v39  ;;  %v2410_v55 = vadd.f32 %v2930_v6, %v2313_v5  ;;  %v2869_v9 = vadd.f32 %v2868_v7, %v2867_v30 }
 0x3d6   :  { %v3245_v43 = vpop.eup %3244  ;;  %3252 = vpow2.f32 %v2821_v3  ;;  %v2870_v11 = vpop.f32.mrf.mxu0  ;;  %v2933_v1 = vadd.f32 %v2932_v8, %v2931_v20 }
 0x3d7   :  { %v2934_v4 = vpop.f32.mrf.mxu1  ;;  %v2502_v25 = vadd.f32 1.0, %v3245_v43  ;;  %v2822_v26 = vmul.f32 -1.442695, %v2410_v55  ;;  %v2318_v53 = vadd.f32 %v2869_v9, %v3950_v56 }
 0x3d8   :  { %v2871_v54 = vpop.f32.mrf.mxu0 }
 0x3d9   :  { %v2935_v21 = vpop.f32.mrf.mxu1  ;;  %3254 = vrcp.f32 %v2502_v25  ;;  %v2415_v12 = vadd.f32 %v2933_v1, %v2318_v53  ;;  %v2872_v13 = vadd.f32 %v2871_v54, %v2870_v11 }
 0x3da   :  { %v3247_v14 = vpop.eup %3246  ;;  %3256 = vpow2.f32 %v2822_v26  ;;  %v2873_v15 = vpop.f32.mrf.mxu0  ;;  %v2936_v10 = vadd.f32 %v2935_v21, %v2934_v4 }
 0x3db   :  { %v2937_v16 = vpop.f32.mrf.mxu1  ;;  %v2503_v18 = vadd.f32 1.0, %v3247_v14  ;;  %v2823_v19 = vmul.f32 -1.442695, %v2415_v12  ;;  %v2321_v27 = vadd.f32 %v2872_v13, %v3950_v56 }
 0x3dc   :  { %v2874_v36 = vpop.f32.mrf.mxu0 }
 0x3dd   :  { %v2938_v50 = vpop.f32.mrf.mxu1  ;;  %3258 = vrcp.f32 %v2503_v18  ;;  %v2418_v22 = vadd.f32 %v2936_v10, %v2321_v27  ;;  %v2875_v0 = vadd.f32 %v2874_v36, %v2873_v15 }
 0x3de   :  { %v3249_v23 = vpop.eup %3248  ;;  %3260 = vpow2.f32 %v2823_v19  ;;  %v2876_v24 = vpop.f32.mrf.mxu0  ;;  %v2939_v34 = vadd.f32 %v2938_v50, %v2937_v16 }
 0x3df   :  { %v2940_v28 = vpop.f32.mrf.mxu1  ;;  %v2504_v31 = vadd.f32 1.0, %v3249_v23  ;;  %v2824_v32 = vmul.f32 -1.442695, %v2418_v22  ;;  %v2326_v33 = vadd.f32 %v2875_v0, %v3950_v56 }
 0x3e0   :  { %v2877_v46 = vpop.f32.mrf.mxu0 }
 0x3e1   :  { %v2941_v35 = vpop.f32.mrf.mxu1  ;;  %3262 = vrcp.f32 %v2504_v31  ;;  %v2423_v47 = vadd.f32 %v2939_v34, %v2326_v33  ;;  %v2878_v37 = vadd.f32 %v2877_v46, %v2876_v24 }
 0x3e2   :  { %v3251_v48 = vpop.eup %3250  ;;  %3264 = vpow2.f32 %v2824_v32  ;;  %v2879_v38 = vpop.f32.mrf.mxu0  ;;  %v2942_v42 = vadd.f32 %v2941_v35, %v2940_v28 }
 0x3e3   :  { %v2943_v45 = vpop.f32.mrf.mxu1  ;;  %v3253_v49 = vpop.eup %3252  ;;  %2549 = vst [vmem:[#allocation14] sm:$0xff] %v3251_v48  ;;  %v2825_v40 = vmul.f32 -1.442695, %v2423_v47  ;;  %v2329_v41 = vadd.f32 %v2878_v37, %v3950_v56 }
 0x3e4   :  { %v2505_v44 = vadd.f32 1.0, %v3253_v49  ;;  %v2880_v51 = vpop.f32.mrf.mxu0 }
 0x3e5   :  { %v2944_v17 = vpop.f32.mrf.mxu1  ;;  %3266 = vpow2.f32 %v2825_v40  ;;  %v2426_v52 = vadd.f32 %v2942_v42, %v2329_v41  ;;  %v2881_v57 = vadd.f32 %v2880_v51, %v2879_v38 }
 0x3e6   :  { %v3255_v29 = vpop.eup %3254  ;;  %3268 = vrcp.f32 %v2505_v44  ;;  %v2882_v58 = vpop.f32.mrf.mxu0  ;;  %v2945_v63 = vadd.f32 %v2944_v17, %v2943_v45 }
 0x3e7   :  { %v2946_v59 = vpop.f32.mrf.mxu1  ;;  %v3257_v60 = vpop.eup %3256  ;;  %2550 = vst [vmem:[#allocation14 + $0x8] sm:$0xff] %v3255_v29  ;;  %v2826_v61 = vmul.f32 -1.442695, %v2426_v52  ;;  %v2334_v62 = vadd.f32 %v2881_v57, %v3950_v56 }
 0x3e8   :  { %v2506_v2 = vadd.f32 1.0, %v3257_v60  ;;  %v2883_v30 = vpop.f32.mrf.mxu0 }
 0x3e9   :  { %v2947_v20 = vpop.f32.mrf.mxu1  ;;  %3270 = vpow2.f32 %v2826_v61  ;;  %v2431_v39 = vadd.f32 %v2945_v63, %v2334_v62  ;;  %v2884_v3 = vadd.f32 %v2883_v30, %v2882_v58 }
 0x3ea   :  { %v3259_v5 = vpop.eup %3258  ;;  %3272 = vrcp.f32 %v2506_v2  ;;  %v2885_v6 = vpop.f32.mrf.mxu0  ;;  %v2948_v43 = vadd.f32 %v2947_v20, %v2946_v59 }
 0x3eb   :  { %v2949_v7 = vpop.f32.mrf.mxu1  ;;  %v3261_v8 = vpop.eup %3260  ;;  %2551 = vst [vmem:[#allocation14 + $0x10] sm:$0xff] %v3259_v5  ;;  %v2827_v55 = vmul.f32 -1.442695, %v2431_v39  ;;  %v2337_v9 = vadd.f32 %v2884_v3, %v3950_v56 }
 0x3ec   :  { %v2507_v11 = vadd.f32 1.0, %v3261_v8  ;;  %v2886_v4 = vpop.f32.mrf.mxu0 }
 0x3ed   :  { %v2950_v25 = vpop.f32.mrf.mxu1  ;;  %3274 = vpow2.f32 %v2827_v55  ;;  %v2434_v26 = vadd.f32 %v2948_v43, %v2337_v9  ;;  %v2887_v53 = vadd.f32 %v2886_v4, %v2885_v6 }
 0x3ee   :  { %v3263_v1 = vpop.eup %3262  ;;  %3276 = vrcp.f32 %v2507_v11  ;;  %v2888_v54 = vpop.f32.mrf.mxu0  ;;  %v2951_v15 = vadd.f32 %v2950_v25, %v2949_v7 }
 0x3ef   :  { %v2952_v21 = vpop.f32.mrf.mxu1  ;;  %v3265_v12 = vpop.eup %3264  ;;  %2552 = vst [vmem:[#allocation14 + $0x18] sm:$0xff] %v3263_v1  ;;  %v2828_v13 = vmul.f32 -1.442695, %v2434_v26  ;;  %v2342_v14 = vadd.f32 %v2887_v53, %v3950_v56 }
 0x3f0   :  { %v2508_v16 = vadd.f32 1.0, %v3265_v12  ;;  %v2889_v18 = vpop.f32.mrf.mxu0 }
 0x3f1   :  { %v2953_v19 = vpop.f32.mrf.mxu1  ;;  %3278 = vpow2.f32 %v2828_v13  ;;  %v2439_v27 = vadd.f32 %v2951_v15, %v2342_v14  ;;  %v2890_v10 = vadd.f32 %v2889_v18, %v2888_v54 }
 0x3f2   :  { %v3267_v36 = vpop.eup %3266  ;;  %3280 = vrcp.f32 %v2508_v16  ;;  %v2891_v50 = vpop.f32.mrf.mxu0  ;;  %v2954_v31 = vadd.f32 %v2953_v19, %v2952_v21 }
 0x3f3   :  { %v2955_v22 = vpop.f32.mrf.mxu1  ;;  %v3269_v0 = vpop.eup %3268  ;;  %v2509_v23 = vadd.f32 1.0, %v3267_v36  ;;  %v2829_v24 = vmul.f32 -1.442695, %v2439_v27  ;;  %v2345_v28 = vadd.f32 %v2890_v10, %v3950_v56 }
 0x3f4   :  { %2553 = vst [vmem:[#allocation14 + $0x20] sm:$0xff] %v3269_v0  ;;  %v2892_v32 = vpop.f32.mrf.mxu0 }
 0x3f5   :  { %v2956_v33 = vpop.f32.mrf.mxu1  ;;  %3282 = vrcp.f32 %v2509_v23  ;;  %v2442_v34 = vadd.f32 %v2954_v31, %v2345_v28  ;;  %v2893_v46 = vadd.f32 %v2892_v32, %v2891_v50 }
 0x3f6   :  { %v3271_v35 = vpop.eup %3270  ;;  %3284 = vpow2.f32 %v2829_v24  ;;  %v2894_v47 = vpop.f32.mrf.mxu0  ;;  %v2957_v40 = vadd.f32 %v2956_v33, %v2955_v22 }
 0x3f7   :  { %v2958_v37 = vpop.f32.mrf.mxu1  ;;  %v3273_v48 = vpop.eup %3272  ;;  %v2510_v38 = vadd.f32 1.0, %v3271_v35  ;;  %v2830_v45 = vmul.f32 -1.442695, %v2442_v34  ;;  %v2350_v49 = vadd.f32 %v2893_v46, %v3950_v56 }
 0x3f8   :  { %2554 = vst [vmem:[#allocation14 + $0x28] sm:$0xff] %v3273_v48  ;;  %v2895_v41 = vpop.f32.mrf.mxu0 }
 0x3f9   :  { %v2959_v42 = vpop.f32.mrf.mxu1  ;;  %3286 = vrcp.f32 %v2510_v38  ;;  %v2447_v44 = vadd.f32 %v2957_v40, %v2350_v49  ;;  %v2896_v51 = vadd.f32 %v2895_v41, %v2894_v47 }
 0x3fa   :  { %v3275_v17 = vpop.eup %3274  ;;  %3288 = vpow2.f32 %v2830_v45  ;;  %v2960_v59 = vadd.f32 %v2959_v42, %v2958_v37 }
 0x3fb   :  { %v3277_v52 = vpop.eup %3276  ;;  %v2511_v57 = vadd.f32 1.0, %v3275_v17  ;;  %v2831_v29 = vmul.f32 -1.442695, %v2447_v44  ;;  %v2353_v58 = vadd.f32 %v2896_v51, %v3950_v56 }
 0x3fc   :  { %2555 = vst [vmem:[#allocation14 + $0x30] sm:$0xff] %v3277_v52 }
 0x3fd   :  { %3290 = vrcp.f32 %v2511_v57  ;;  %v2450_v60 = vadd.f32 %v2960_v59, %v2353_v58 }
 0x3fe   :  { %v3279_v61 = vpop.eup %3278  ;;  %3292 = vpow2.f32 %v2831_v29 }
 0x3ff   :  { %v3281_v62 = vpop.eup %3280  ;;  %v2512_v63 = vadd.f32 1.0, %v3279_v61  ;;  %v2832_v2 = vmul.f32 -1.442695, %v2450_v60 }
 0x400   :  { %2556 = vst [vmem:[#allocation14 + $0x38] sm:$0xff] %v3281_v62 }
 0x401   :  { %3294 = vrcp.f32 %v2512_v63 }
 0x402   :  { %v3283_v30 = vpop.eup %3282  ;;  %3296 = vpow2.f32 %v2832_v2 }
 0x403   :  { %v3285_v20 = vpop.eup %3284  ;;  %2557 = vst [vmem:[#allocation14 + $0x40] sm:$0xff] %v3283_v30 }
 0x404   :  { %v2513_v39 = vadd.f32 1.0, %v3285_v20 }
 0x406   :  { %v3287_v3 = vpop.eup %3286  ;;  %3298 = vrcp.f32 %v2513_v39 }
 0x407   :  { %v3289_v5 = vpop.eup %3288  ;;  %2558 = vst [vmem:[#allocation14 + $0x48] sm:$0xff] %v3287_v3 }
 0x408   :  { %v2514_v56 = vadd.f32 1.0, %v3289_v5 }
 0x40a   :  { %v3291_v6 = vpop.eup %3290  ;;  %3300 = vrcp.f32 %v2514_v56 }
 0x40b   :  { %v3293_v7 = vpop.eup %3292  ;;  %2559 = vst [vmem:[#allocation14 + $0x50] sm:$0xff] %v3291_v6 }
 0x40c   :  { %v2515_v8 = vadd.f32 1.0, %v3293_v7 }
 0x40e   :  { %v3295_v55 = vpop.eup %3294  ;;  %3302 = vrcp.f32 %v2515_v8 }
 0x40f   :  { %v3297_v9 = vpop.eup %3296  ;;  %2560 = vst [vmem:[#allocation14 + $0x58] sm:$0xff] %v3295_v55 }
 0x410   :  { %v2516_v43 = vadd.f32 1.0, %v3297_v9 }
 0x412   :  { %3304 = vrcp.f32 %v2516_v43 }
 0x413   :  { %v3299_v11 = vpop.eup %3298 }
 0x414   :  { %2561 = vst [vmem:[#allocation14 + $0x60] sm:$0xff] %v3299_v11 }
 0x417   :  { %v3301_v4 = vpop.eup %3300 }
 0x418   :  { %2562 = vst [vmem:[#allocation14 + $0x68] sm:$0xff] %v3301_v4 }
 0x41b   :  { %v3303_v25 = vpop.eup %3302 }
 0x41c   :  { %2563 = vst [vmem:[#allocation14 + $0x70] sm:$0xff] %v3303_v25 }
 0x41f   :  { %v3305_v26 = vpop.eup %3304 }
 0x420   :  { %2564 = vst [vmem:[#allocation14 + $0x78] sm:$0xff] %v3305_v26 }
 0x421   :  { %3497 = shalt.err (!%p3494_p7)
}
 0x422   :  { %2608 = dma.vmem_to_hbm [thread:$0]  %s2603_s12, 2048, %s3984_s10, [#allocation4], %s3519_s24, %s3519_s24, %s3520_s25  }
 0x423   :  { %3514 = dma.done.wait [#allocation4], 2048  }
 0x424   :  { %3515 = vsyncadd [#allocation4], 4294965248 }
 0x425   :  { %3516 = dma.done.wait [#allocation16], 4096  }
 0x426   :  { %3517 = vsyncadd [#allocation16], 4294963200 }
 0x427   :  { %2642 = vsyncpa [#allocation3], 1 }
 0x428   :  { %2643 = vsyncpa [#allocation6], 1 }
 0x429   :  { %2644 = vsyncpa [#allocation9], 1 }
 0x42a   :  { %2645 = vsyncpa [#allocation12], 1 }
 0x42b   :  { %2646 = vsyncpa [#allocation4], 1 }
 0x42c   :  { %2647 = vsyncpa [#allocation16], 1 }

</bundles_post_ra>
